<compile_context>
chip_gen: v7x
topology: tpu7x:2x2x1
jax: 0.10.0
libtpu: 0.0.40
codegen_flags: <defaults>
</compile_context>

<pallas_src>
import functools
import math

import jax
import jax.numpy as jnp
from jax.experimental import pallas as pl
from jax.experimental.pallas import tpu as pltpu


def _pe_kernel(aux_ref, o_ref, *, fold: int):
    """Writes one (block_rows, width) tile of the folded PE table.

    Folded layout: element (r, c) corresponds to PE[r*fold + c // d_model,
    c % d_model]; with fold == 1 it is the plain (seq, d_model) table.

    aux rows (per-column constants, precomputed on host, VMEM-resident):
      0: inv_freq[c] = exp(-(2*((c % d_model)//2)) * ln(10000)/d_model)
      1: phase[c]    = 0 for even c%d_model (sin), pi/2 for odd (cos = sin(x+pi/2))
      2: fold_off[c] = float(c // d_model)
    """
    rows, _ = o_ref.shape
    r0 = pl.program_id(0) * rows

    inv_freq = aux_ref[0:1, :]      # (1, width) -> lane broadcast below
    phase = aux_ref[1:2, :]         # (1, width)

    # Folded-row index as a (rows, 1) sublane iota; broadcasting does the rest.
    r = (jax.lax.broadcasted_iota(jnp.int32, (rows, 1), 0) + r0).astype(jnp.float32)
    if fold == 1:
        pos = r                                       # (rows, 1)
    else:
        # Exact small-integer arithmetic in f32: r*fold and the add are exact.
        pos = r * float(fold) + aux_ref[2:3, :]       # (rows, width)

    o_ref[...] = jnp.sin(pos * inv_freq + phase)


@functools.lru_cache(maxsize=None)
def _pe_table(d_model: int, max_len: int) -> jax.Array:
    """Builds (once per (d_model, max_len)) the full (max_len, d_model) f32 table."""
    assert d_model % 2 == 0, "d_model must be even (sin/cos pairs)"

    # Fold rows into the lane dimension so the folded width is a multiple of 128
    # -> lane-dense (unmasked) stores for any even d_model (d=32 -> fold 4,
    # d=96 -> fold 4, d=128k -> fold 1).
    fold = 128 // math.gcd(d_model, 128)
    width = fold * d_model

    total_rows = pl.cdiv(max_len, fold)               # rows of the folded table

    # Block sizing: <= 8 MiB per block and <= 2048 folded rows. The pipeline
    # double-buffers the output, so VMEM use is <= ~16 MiB -> safe on v5e/v6e/v7x.
    budget_bytes = 8 * 1024 * 1024
    rows_budget = max(8, (budget_bytes // (width * 4)) // 8 * 8)
    block_rows = min(min(2048, rows_budget), pl.cdiv(total_rows, 8) * 8)
    padded_rows = pl.cdiv(total_rows, block_rows) * block_rows

    # Per-column constants, computed once on the host (same jnp.exp the reference
    # construction uses) and kept VMEM-resident across all grid steps.
    col = jnp.arange(width, dtype=jnp.int32) % d_model
    pair = ((col // 2) * 2).astype(jnp.float32)
    inv_freq = jnp.exp(pair * (-math.log(10000.0) / d_model))
    phase = jnp.where((col % 2) == 0, 0.0, math.pi / 2.0).astype(jnp.float32)
    fold_off = (jnp.arange(width, dtype=jnp.int32) // d_model).astype(jnp.float32)
    aux = jnp.zeros((8, width), jnp.float32)
    aux = aux.at[0].set(inv_freq).at[1].set(phase).at[2].set(fold_off)

    kernel = functools.partial(_pe_kernel, fold=fold)
    folded = pl.pallas_call(
        kernel,
        out_shape=jax.ShapeDtypeStruct((padded_rows, width), jnp.float32),
        grid_spec=pltpu.PrefetchScalarGridSpec(
            num_scalar_prefetch=0,
            grid=(padded_rows // block_rows,),
            in_specs=[pl.BlockSpec((8, width), lambda i: (0, 0))],
            out_specs=pl.BlockSpec((block_rows, width), lambda i: (i, 0)),
        ),
        compiler_params=pltpu.CompilerParams(
            dimension_semantics=("parallel",),
            vmem_limit_bytes=32 * 1024 * 1024),
    )(aux)

    # Row-major unfold back to (max_len, d_model); done once, at build time.
    pe = folded.reshape(padded_rows * fold, d_model)[:max_len]
    return jax.block_until_ready(pe)


@functools.lru_cache(maxsize=None)
def _pe_slice(seq: int, d_model: int, max_len: int) -> jax.Array:
    # TODO(synk): lru_cache pins the table/slice to the device active at first
    # call; re-key on device/sharding for multi-device setups.
    table = _pe_table(d_model, max_len)
    return jax.block_until_ready(table[:seq][None, :, :])


def positional_embedding(x: jax.Array, d_model: int, max_len: int = 512) -> jax.Array:
    """forward(x): returns pe[:, :x.shape[1]] with shape (1, seq, d_model)."""
    seq = x.shape[1]
    assert seq <= max_len, "sequence longer than max_len"
    return _pe_slice(seq, d_model, max_len)


def _reference_pe(seq: int, d_model: int) -> jnp.ndarray:
    # Pure-JAX reference mirroring the PyTorch __init__ construction.
    pos = jnp.arange(seq, dtype=jnp.float32)[:, None]
    div_term = jnp.exp(jnp.arange(0, d_model, 2, dtype=jnp.float32)
                       * (-math.log(10000.0) / d_model))
    pe = jnp.zeros((seq, d_model), jnp.float32)
    pe = pe.at[:, 0::2].set(jnp.sin(pos * div_term))
    pe = pe.at[:, 1::2].set(jnp.cos(pos * div_term))
    return pe[None]


if __name__ == "__main__":
    key = jax.random.PRNGKey(0)

    # Small case from the module spec (fold=4, width=128, lane-dense path).
    batch, seq, d_model = 2, 16, 32
    x = jax.random.normal(key, (batch, seq, d_model), dtype=jnp.float32)
    out = jax.block_until_ready(positional_embedding(x, d_model=d_model, max_len=512))
    ref = _reference_pe(seq, d_model)
    assert out.shape == (1, seq, d_model), out.shape
    assert out.dtype == jnp.float32
    assert jnp.allclose(out, ref, atol=5e-5, rtol=1e-5), "mismatch vs reference (d=32)"

    # Wider case (fold=1 path, non-multiple-of-8 seq).
    seq2, d2 = 40, 128
    x2 = jnp.zeros((1, seq2, d2), jnp.float32)
    out2 = jax.block_until_ready(positional_embedding(x2, d_model=d2, max_len=512))
    ref2 = _reference_pe(seq2, d2)
    assert out2.shape == (1, seq2, d2)
    assert jnp.allclose(out2, ref2, atol=5e-5, rtol=1e-5), "mismatch vs reference (d=128)"

    # Non-power-of-two narrow d_model (generalized fold: fold=4, width=384).
    seq3, d3 = 24, 96
    x3 = jnp.zeros((2, seq3, d3), jnp.float32)
    out3 = jax.block_until_ready(positional_embedding(x3, d_model=d3, max_len=512))
    ref3 = _reference_pe(seq3, d3)
    assert out3.shape == (1, seq3, d3)
    assert jnp.allclose(out3, ref3, atol=5e-5, rtol=1e-5), "mismatch vs reference (d=96)"

    # Repeat call: hits the slice cache, no new dispatch.
    out_again = positional_embedding(x, d_model=d_model, max_len=512)
    assert out_again is out

    print("KERNEL_OK")
</pallas_src>

<mosaic_0001>
module attributes {stable_mosaic.version = 11 : i64} {
  func.func @_pe_kernel(%arg0: i32, %arg1: memref<8x128xf32, #tpu.memory_space<vmem>>, %arg2: memref<128x128xf32, #tpu.memory_space<vmem>>) attributes {dimension_semantics = [#tpu.dimension_semantics<parallel>], iteration_bounds = array<i64: 1>, scalar_prefetch = 0 : i64, scratch_operands = 0 : i64, tpu.core_type = #tpu.core_type<tc>, window_params = [{pipeline_mode = #tpu.pipeline_mode<synchronous>, transform_indices = @transform_0, window_bounds = array<i64: 8, 128>}, {transform_indices = @transform_1, window_bounds = array<i64: 128, 128>}]} {
    %c128_i32 = arith.constant 128 : i32
    %0 = arith.muli %arg0, %c128_i32 : i32
    %c0 = arith.constant 0 : index
    %c0_0 = arith.constant 0 : index
    %1 = vector.load %arg1[%c0, %c0_0] : memref<8x128xf32, #tpu.memory_space<vmem>>, vector<1x128xf32>
    %c1 = arith.constant 1 : index
    %c0_1 = arith.constant 0 : index
    %2 = vector.load %arg1[%c1, %c0_1] : memref<8x128xf32, #tpu.memory_space<vmem>>, vector<1x128xf32>
    %3 = tpu.iota {dimensions = array<i32: 0>} : vector<128x1xi32>
    %4 = vector.broadcast %0 : i32 to vector<128x1xi32>
    %5 = arith.addi %3, %4 : vector<128x1xi32>
    %6 = arith.sitofp %5 : vector<128x1xi32> to vector<128x1xf32>
    %cst = arith.constant 4.000000e+00 : f32
    %7 = vector.broadcast %cst : f32 to vector<128x1xf32>
    %8 = arith.mulf %6, %7 : vector<128x1xf32>
    %c2 = arith.constant 2 : index
    %c0_2 = arith.constant 0 : index
    %9 = vector.load %arg1[%c2, %c0_2] : memref<8x128xf32, #tpu.memory_space<vmem>>, vector<1x128xf32>
    %10 = vector.broadcast %8 : vector<128x1xf32> to vector<128x128xf32>
    %11 = vector.broadcast %9 : vector<1x128xf32> to vector<128x128xf32>
    %12 = arith.addf %10, %11 : vector<128x128xf32>
    %13 = vector.broadcast %1 : vector<1x128xf32> to vector<128x128xf32>
    %14 = arith.mulf %12, %13 : vector<128x128xf32>
    %15 = vector.broadcast %2 : vector<1x128xf32> to vector<128x128xf32>
    %16 = arith.addf %14, %15 : vector<128x128xf32>
    %17 = math.sin %16 : vector<128x128xf32>
    %c0_3 = arith.constant 0 : index
    %c0_4 = arith.constant 0 : index
    %18 = vector.load %arg2[%c0_3, %c0_4] : memref<128x128xf32, #tpu.memory_space<vmem>>, vector<128x128xf32>
    tpu.vector_store %arg2[%c0_3, %c0_4], %17 {strides = array<i32>} : memref<128x128xf32, #tpu.memory_space<vmem>>, vector<128x128xf32>,
    return
  }
  func.func @transform_0(%arg0: i32) -> (i32, i32) {
    %c0_i32 = arith.constant 0 : i32
    %c0_i32_0 = arith.constant 0 : i32
    %c0_i32_1 = arith.constant 0 : i32
    return %c0_i32, %c0_i32_0 : i32, i32
  }
  func.func @transform_1(%arg0: i32) -> (i32, i32) {
    %c0_i32 = arith.constant 0 : i32
    %c0_i32_0 = arith.constant 0 : i32
    return %arg0, %c0_i32 : i32, i32
  }
}

</mosaic_0001>

<bundles_post_ra>
// kernel: tpu_custom_call.1
= control target key start
LH: loop header
LB: loop body
LE: loop exit
PB: predicated region body
PF: predicated region fallthrough
CT: control target
= control target key end

     0   :  { %6 = vsyncpa [#allocation3], 0  ;;  %s3433_s0 = inlined_call_operand.hbm [shape: f32[8,128], index: 0, kind: input, shape index: {}]   ;;  %s3434_s1 = inlined_call_operand.hbm [shape: f32[128,128], index: 1, kind: output, shape index: {}]  }
   0x1   :  { %7 = vsyncpa [#allocation4], 0  ;;  %s2101_s6 = smov [#allocation2]   ;;  %s2053_s10 = scalar_lea.hbm %s3433_s0, 128 }
   0x2   :  { %s14_s7 = sshll.u32 %s2101_s6, 4  ;;  %p2054_p0 = scmp.ne.s32.totalorder %s3433_s0, %s2053_s10  ;;  %s15_s7 = int_to_ptr.vmem [resolvable:$true] %s14_s7 }
   0x3   :  { %p2057_p1 = scmp.lt.u32.totalorder %s2053_s10, %s3433_s0 }
   0x5   :  { %p2059_p2 = pnand %p2057_p1, %p2054_p0 }
   0x7   :  { %2062 = shalt.err (!%p2059_p2)
}
   0x8   :  { %s2063_s15 = scalar_lea.vmem %s15_s7, 128  ;;  %p2068_p4 = scmp.lt.s32.totalorder %s15_s7, %s15_s7 }
   0x9   :  { %p2064_p3 = scmp.ne.s32.totalorder %s15_s7, %s2063_s15  ;;  %p2069_p5 = scmp.lt.s32.totalorder %s2063_s15, %s2063_s15 }
   0xb   :  { %p2070_p6 = por %p2069_p5, %p2068_p4 }
   0xd   :  { %p2071_p7 = pnand %p2070_p6, %p2064_p3 }
   0xf   :  { %2074 = shalt.err (!%p2071_p7)
}
  0x10   :  { %17 = dma.hbm_to_vmem [thread:$0]  %s3433_s0, 128, %s15_s7, [#allocation3]  }
  0x11   :  { %2097 = dma.done.wait [#allocation3], 128  }
  0x12   :  { %2098 = vsyncadd [#allocation3], 4294967168  ;;  %v24_v0 = vlaneseq  ;;  %v1848_v39 = vld [vmem:[#allocation2 + $0x2] ss:$0 sm:$0xff]  ;;  %v1849_v52 = vld [vmem:[#allocation2] ss:$0 sm:$0xff] }
  0x13   :  { %s2108_s0 = smov [#allocation5]  }
  0x14   :  { %v25_v1 = vshrl.u32 %v24_v0, 7  ;;  %s1836_s18 = sshll.u32 %s2108_s0, 4  ;;  %s1837_s18 = int_to_ptr.vmem [resolvable:$true] %s1836_s18 }
  0x15   :  { %s2075_s19 = scalar_lea.vmem %s1837_s18, 2048  ;;  %p2080_p9 = scmp.lt.s32.totalorder %s1837_s18, %s1837_s18 }
  0x16   :  { %v26_v2 = vadd.s32 8, %v25_v1  ;;  %v29_v3 = vadd.s32 32, %v25_v1  ;;  %v30_v4 = vadd.s32 40, %v25_v1  ;;  %v31_v5 = vadd.s32 48, %v25_v1  ;;  %p2076_p8 = scmp.ne.s32.totalorder %s1837_s18, %s2075_s19  ;;  %p2081_p10 = scmp.lt.s32.totalorder %s2075_s19, %s2075_s19 }
  0x17   :  { %v32_v6 = vadd.s32 56, %v25_v1  ;;  %v33_v7 = vadd.s32 64, %v25_v1  ;;  %v34_v8 = vadd.s32 72, %v25_v1  ;;  %v35_v9 = vadd.s32 80, %v25_v1 }
  0x18   :  { %v36_v10 = vadd.s32 88, %v25_v1  ;;  %v37_v11 = vadd.s32 96, %v25_v1  ;;  %v27_v12 = vadd.s32 16, %v25_v1  ;;  %v38_v13 = vadd.s32 104, %v25_v1  ;;  %p2082_p11 = por %p2081_p10, %p2080_p9 }
  0x19   :  { %v39_v14 = vadd.s32 112, %v25_v1  ;;  %v40_v15 = vadd.s32 120, %v25_v1  ;;  %v58_v16 = vcvt.s32.f32 %v25_v1  ;;  %v59_v17 = vcvt.s32.f32 %v26_v2 }
  0x1a   :  { %v62_v18 = vcvt.s32.f32 %v29_v3  ;;  %v63_v19 = vcvt.s32.f32 %v30_v4  ;;  %v64_v20 = vcvt.s32.f32 %v31_v5  ;;  %v65_v21 = vcvt.s32.f32 %v32_v6  ;;  %v1850_v5 = vld [vmem:[#allocation2 + $0x1] ss:$0 sm:$0xff]  ;;  %p2083_p12 = pnand %p2082_p11, %p2076_p8 }
  0x1b   :  { %v66_v22 = vcvt.s32.f32 %v33_v7  ;;  %v67_v23 = vcvt.s32.f32 %v34_v8  ;;  %v68_v24 = vcvt.s32.f32 %v35_v9  ;;  %v69_v25 = vcvt.s32.f32 %v36_v10 }
  0x1c   :  { %v70_v26 = vcvt.s32.f32 %v37_v11  ;;  %v28_v27 = vadd.s32 24, %v25_v1  ;;  %v71_v28 = vcvt.s32.f32 %v38_v13  ;;  %v72_v29 = vcvt.s32.f32 %v39_v14 }
  0x1d   :  { %v73_v30 = vcvt.s32.f32 %v40_v15  ;;  %v60_v31 = vcvt.s32.f32 %v27_v12  ;;  %v74_v32 = vmul.f32 4.0, %v58_v16  ;;  %v75_v33 = vmul.f32 4.0, %v59_v17 }
  0x1e   :  { %v78_v34 = vmul.f32 4.0, %v62_v18  ;;  %v79_v35 = vmul.f32 4.0, %v63_v19  ;;  %v80_v36 = vmul.f32 4.0, %v64_v20  ;;  %v81_v37 = vmul.f32 4.0, %v65_v21 }
  0x1f   :  { %v82_v38 = vmul.f32 4.0, %v66_v22  ;;  %v83_v40 = vmul.f32 4.0, %v67_v23  ;;  %v84_v41 = vmul.f32 4.0, %v68_v24  ;;  %v85_v42 = vmul.f32 4.0, %v69_v25 }
  0x20   :  { %v86_v43 = vmul.f32 4.0, %v70_v26  ;;  %v61_v44 = vcvt.s32.f32 %v28_v27  ;;  %v87_v45 = vmul.f32 4.0, %v71_v28  ;;  %v88_v46 = vmul.f32 4.0, %v72_v29 }
  0x21   :  { %v89_v47 = vmul.f32 4.0, %v73_v30  ;;  %v76_v48 = vmul.f32 4.0, %v60_v31  ;;  %v95_v49 = vadd.f32 %v1848_v39, %v74_v32  ;;  %v96_v50 = vadd.f32 %v1848_v39, %v75_v33 }
  0x22   :  { %v99_v51 = vadd.f32 %v1848_v39, %v78_v34  ;;  %v100_v53 = vadd.f32 %v1848_v39, %v79_v35  ;;  %v101_v54 = vadd.f32 %v1848_v39, %v80_v36  ;;  %v102_v55 = vadd.f32 %v1848_v39, %v81_v37 }
  0x23   :  { %v103_v56 = vadd.f32 %v1848_v39, %v82_v38  ;;  %v104_v57 = vadd.f32 %v1848_v39, %v83_v40  ;;  %v105_v58 = vadd.f32 %v1848_v39, %v84_v41  ;;  %v106_v59 = vadd.f32 %v1848_v39, %v85_v42 }
  0x24   :  { %v107_v60 = vadd.f32 %v1848_v39, %v86_v43  ;;  %v77_v61 = vmul.f32 4.0, %v61_v44  ;;  %v108_v62 = vadd.f32 %v1848_v39, %v87_v45  ;;  %v109_v63 = vadd.f32 %v1848_v39, %v88_v46 }
  0x25   :  { %v110_v0 = vadd.f32 %v1848_v39, %v89_v47  ;;  %v97_v1 = vadd.f32 %v1848_v39, %v76_v48  ;;  %v115_v2 = vmul.f32 %v1849_v52, %v95_v49  ;;  %v116_v3 = vmul.f32 %v1849_v52, %v96_v50 }
  0x26   :  { %v119_v4 = vmul.f32 %v1849_v52, %v99_v51  ;;  %v120_v6 = vmul.f32 %v1849_v52, %v100_v53  ;;  %v121_v7 = vmul.f32 %v1849_v52, %v101_v54  ;;  %v122_v8 = vmul.f32 %v1849_v52, %v102_v55 }
  0x27   :  { %v123_v9 = vmul.f32 %v1849_v52, %v103_v56  ;;  %v124_v10 = vmul.f32 %v1849_v52, %v104_v57  ;;  %v125_v11 = vmul.f32 %v1849_v52, %v105_v58  ;;  %v126_v12 = vmul.f32 %v1849_v52, %v106_v59 }
  0x28   :  { %v127_v13 = vmul.f32 %v1849_v52, %v107_v60  ;;  %v98_v14 = vadd.f32 %v1848_v39, %v77_v61  ;;  %v128_v15 = vmul.f32 %v1849_v52, %v108_v62  ;;  %v129_v16 = vmul.f32 %v1849_v52, %v109_v63 }
  0x29   :  { %v130_v17 = vmul.f32 %v1849_v52, %v110_v0  ;;  %v117_v18 = vmul.f32 %v1849_v52, %v97_v1  ;;  %v2133_v19 = vadd.f32 %v1850_v5, %v115_v2  ;;  %v2135_v20 = vadd.f32 %v1850_v5, %v116_v3 }
  0x2a   :  { %v2137_v21 = vadd.f32 %v1850_v5, %v119_v4  ;;  %v2139_v22 = vadd.f32 %v1850_v5, %v120_v6  ;;  %v2141_v23 = vadd.f32 %v1850_v5, %v121_v7  ;;  %v2143_v24 = vadd.f32 %v1850_v5, %v122_v8 }
  0x2b   :  { %v2145_v25 = vadd.f32 %v1850_v5, %v123_v9  ;;  %v2147_v26 = vadd.f32 %v1850_v5, %v124_v10  ;;  %v2149_v27 = vadd.f32 %v1850_v5, %v125_v11  ;;  %v2151_v28 = vadd.f32 %v1850_v5, %v126_v12 }
  0x2c   :  { %v2153_v29 = vadd.f32 %v1850_v5, %v127_v13  ;;  %v2155_v30 = vadd.f32 %v1850_v5, %v128_v15  ;;  %v2157_v31 = vadd.f32 %v1850_v5, %v129_v16  ;;  %v2159_v32 = vadd.f32 %v1850_v5, %v130_v17 }
  0x2d   :  { %v151_v33 = vand.u32 2147483647, %v2133_v19  ;;  %v2162_v34 = vadd.f32 %v1850_v5, %v117_v18  ;;  %v154_v35 = vand.u32 2139095040, %v2133_v19  ;;  %v255_v36 = vand.u32 2147483647, %v2135_v20 }
  0x2e   :  { %v258_v38 = vand.u32 2139095040, %v2135_v20  ;;  %v118_v40 = vmul.f32 %v1849_v52, %v98_v14  ;;  %v2102_v1 = vmov 683565275   ;;  %v2103_v3 = vmov 2475754826  }
  0x2f   :  { %v158_v37 = vand.u32 8388607, %v151_v33  ;;  %v155_v39 = vshrl.u32 %v154_v35, 23  ;;  %v262_v42 = vand.u32 8388607, %v255_v36  ;;  %v362_v44 = vand.u32 2139095040, %v2162_v34 }
  0x30   :  { %v259_v41 = vshrl.u32 %v258_v38, 23  ;;  %v359_v48 = vand.u32 2147483647, %v2162_v34  ;;  %v2173_v50 = vadd.f32 %v1850_v5, %v118_v40  ;;  %v2104_v5 = vmov 2131351028  }
  0x31   :  { %v1851_v43 = vadd.s32 4294967169, %v155_v39  ;;  %v159_v45 = vor.u32 8388608, %v158_v37  ;;  %v363_v49 = vshrl.u32 %v362_v44, 23  ;;  %v263_v51 = vor.u32 8388608, %v262_v42 }
  0x32   :  { %v1855_v46 = vadd.s32 4294967169, %v259_v41  ;;  %v2179_v59 = vand.u32 8388607, %v359_v48  ;;  %v466_v63 = vand.u32 2139095040, %v2173_v50  ;;  %v2105_v7 = vmov 2102212464  }
  0x33   :  { %v161_v47 = vadd.s32 1, %v1851_v43  ;;  %v1859_v54 = vadd.s32 4294967169, %v363_v49  ;;  %v2175_v55 = vshll.u32 %v159_v45, 8  ;;  %v2181_v61 = vshll.u32 %v263_v51, 8 }
  0x34   :  { %v265_v53 = vadd.s32 1, %v1855_v46  ;;  %v2106_v9 = vmov 920167782   ;;  %v2107_v17 = vmov 1326507024   ;;  %vm153_vm13 = vcmp.lt.s32.totalorder %v2133_v19, 0 }
  0x35   :  { %vm162_vm0 = vcmp.gt.s32.totalorder %v161_v47, 0  ;;  %v2183_v62 = vadd.s32 1, %v1859_v54  ;;  %vm2286_vm14 = vcmp.le.f32.partialorder %v151_v33, 0.7853982  ;;  %vm257_vm15 = vcmp.lt.s32.totalorder %v2135_v20, 0 }
  0x36   :  { %v163_v52 = vsel %vm162_vm0, %v161_v47, 0  ;;  %vm266_vm1 = vcmp.gt.s32.totalorder %v265_v53, 0 }
  0x37   :  { %v164_v56 = vshrl.u32 %v163_v52, 5  ;;  %v165_v57 = vand.u32 31, %v163_v52  ;;  %v267_v58 = vsel %vm266_vm1, %v265_v53, 0  ;;  %vm370_vm11 = vcmp.gt.s32.totalorder %v2183_v62, 0 }
  0x38   :  { %v269_v60 = vand.u32 31, %v267_v58  ;;  %v2191_v11 = vshrl.u32 %v267_v58, 5 }
  0x39   :  { %v166_v0 = vsub.s32 32, %v165_v57  ;;  %v168_v2 = vshll.u32 %v2102_v1, %v165_v57  ;;  %v171_v4 = vshll.u32 %v2103_v3, %v165_v57  ;;  %v174_v6 = vshll.u32 %v2104_v5, %v165_v57 }
  0x3a   :  { %v177_v8 = vshll.u32 %v2105_v7, %v165_v57  ;;  %v180_v10 = vshll.u32 %v2106_v9, %v165_v57  ;;  %vm183_vm2 = vcmp.lt.s32.totalorder %v164_v56, 1  ;;  %vm184_vm3 = vcmp.lt.s32.totalorder %v164_v56, 2 }
  0x3b   :  { %v167_v12 = vshrl.u32 %v2102_v1, %v166_v0  ;;  %v169_v13 = vshrl.u32 %v2103_v3, %v166_v0  ;;  %v172_v14 = vshrl.u32 %v2104_v5, %v166_v0  ;;  %v175_v15 = vshrl.u32 %v2105_v7, %v166_v0 }
  0x3c   :  { %v178_v16 = vshrl.u32 %v2106_v9, %v166_v0  ;;  %v181_v18 = vshrl.u32 %v2107_v17, %v166_v0  ;;  %vm186_vm4 = vcmp.lt.s32.totalorder %v164_v56, 4  ;;  %v270_v39 = vsub.s32 32, %v269_v60 }
  0x3d   :  { %v170_v35 = vor.u32 %v169_v13, %v168_v2  ;;  %v173_v37 = vor.u32 %v172_v14, %v171_v4  ;;  %v176_v38 = vor.u32 %v175_v15, %v174_v6  ;;  %vm185_vm5 = vcmp.lt.s32.totalorder %v164_v56, 3 }
  0x3e   :  { %v179_v40 = vor.u32 %v178_v16, %v177_v8  ;;  %v182_v41 = vor.u32 %v181_v18, %v180_v10  ;;  %v272_v42 = vshll.u32 %v2102_v1, %v269_v60  ;;  %v275_v53 = vshll.u32 %v2103_v3, %v269_v60 }
  0x3f   :  { %v187_v43 = vsel %vm183_vm2, %v167_v12, %v170_v35  ;;  %v188_v44 = vsel %vm186_vm4, %v176_v38, 2102212464  ;;  %v191_v45 = vsel %vm183_vm2, %v170_v35, %v173_v37  ;;  %v195_v46 = vsel %vm183_vm2, %v173_v37, %v176_v38 }
  0x40   :  { %v189_v47 = vsel %vm185_vm5, %v173_v37, %v188_v44  ;;  %v192_v49 = vsel %vm186_vm4, %v179_v40, 920167782  ;;  %v196_v51 = vsel %vm186_vm4, %v182_v41, 1326507024  ;;  %v271_v57 = vshrl.u32 %v2102_v1, %v270_v39 }
  0x41   :  { %v193_v54 = vsel %vm185_vm5, %v176_v38, %v192_v49  ;;  %v197_v52 = vsel %vm185_vm5, %v179_v40, %v196_v51  ;;  %v273_v58 = vshrl.u32 %v2103_v3, %v270_v39  ;;  %v190_v0 = vsel %vm184_vm3, %v187_v43, %v189_v47 }
  0x42   :  { %v194_v2 = vsel %vm184_vm3, %v191_v45, %v193_v54  ;;  %v198_v4 = vsel %vm184_vm3, %v195_v46, %v197_v52  ;;  %v276_v6 = vshrl.u32 %v2104_v5, %v270_v39  ;;  %v278_v16 = vshll.u32 %v2104_v5, %v269_v60 }
  0x43   :  { %v2211_v8 = vmul.u32.u64.low %v2175_v55, %v198_v4  ;;  %v2212_v10 = vmul.u32.u64.high %v2175_v55, %v198_v4, %v2211_v8  ;;  %v2215_v12 = vmul.u32.u64.low %v2175_v55, %v194_v2  ;;  %v2216_v13 = vmul.u32.u64.high %v2175_v55, %v194_v2, %v2215_v12 }
  0x44   :  { %v274_v14 = vor.u32 %v273_v58, %v272_v42  ;;  %v277_v15 = vor.u32 %v276_v6, %v275_v53  ;;  %v279_v18 = vshrl.u32 %v2105_v7, %v270_v39  ;;  %v281_v56 = vshll.u32 %v2105_v7, %v269_v60 }
  0x45   :  { %v282_v35 = vshrl.u32 %v2106_v9, %v270_v39  ;;  %v284_v37 = vshll.u32 %v2106_v9, %v269_v60  ;;  %v285_v38 = vshrl.u32 %v2107_v17, %v270_v39  ;;  %v206_v40 = vmul.u32 %v2175_v55, %v190_v0 }
  0x46   :  { %v280_v41 = vor.u32 %v279_v18, %v278_v16  ;;  %vm287_vm6 = vcmp.lt.s32.totalorder %v2191_v11, 1  ;;  %vm288_vm7 = vcmp.lt.s32.totalorder %v2191_v11, 2  ;;  %vm208_vm8 = vc.u32 %v2212_v10, %v2215_v12 }
  0x47   :  { %v209_v42 = vadd.s32 1, %v2216_v13  ;;  %v283_v43 = vor.u32 %v282_v35, %v281_v56  ;;  %vm289_vm9 = vcmp.lt.s32.totalorder %v2191_v11, 3  ;;  %v286_v44 = vor.u32 %v285_v38, %v284_v37 }
  0x48   :  { %vm290_vm10 = vcmp.lt.s32.totalorder %v2191_v11, 4  ;;  %v291_v60 = vsel %vm287_vm6, %v271_v57, %v274_v14  ;;  %v295_v39 = vsel %vm287_vm6, %v274_v14, %v277_v15  ;;  %v299_v47 = vsel %vm287_vm6, %v277_v15, %v280_v41 }
  0x49   :  { %v210_v55 = vsel %vm208_vm8, %v209_v42, %v2216_v13  ;;  %v292_v45 = vsel %vm290_vm10, %v280_v41, 2102212464  ;;  %v296_v46 = vsel %vm290_vm10, %v283_v43, 920167782  ;;  %v300_v54 = vsel %vm290_vm10, %v286_v44, 1326507024 }
  0x4a   :  { %v211_v49 = vadd.s32 %v210_v55, %v206_v40  ;;  %v293_v51 = vsel %vm289_vm9, %v277_v15, %v292_v45  ;;  %v297_v53 = vsel %vm289_vm9, %v280_v41, %v296_v46  ;;  %v301_v0 = vsel %vm289_vm9, %v283_v43, %v300_v54 }
  0x4b   :  { %v294_v52 = vsel %vm288_vm7, %v291_v60, %v293_v51  ;;  %v298_v58 = vsel %vm288_vm7, %v295_v39, %v297_v53  ;;  %v302_v2 = vsel %vm288_vm7, %v299_v47, %v301_v0  ;;  %v371_v14 = vsel %vm370_vm11, %v2183_v62, 0 }
  0x4c   :  { %v212_v57 = vadd.s32 536870912, %v211_v49  ;;  %v2242_v4 = vmul.u32.u64.low %v2181_v61, %v298_v58  ;;  %v2243_v6 = vmul.u32.u64.high %v2181_v61, %v298_v58, %v2242_v4  ;;  %v373_v16 = vand.u32 31, %v371_v14 }
  0x4d   :  { %v2247_v8 = vmul.u32.u64.low %v2181_v61, %v302_v2  ;;  %v2248_v13 = vmul.u32.u64.high %v2181_v61, %v302_v2, %v2247_v8  ;;  %v463_v18 = vand.u32 2147483647, %v2173_v50  ;;  %v310_v56 = vmul.u32 %v2181_v61, %v294_v52 }
  0x4e   :  { %v213_v15 = vshrl.u32 %v212_v57, 30  ;;  %v367_v11 = vor.u32 8388608, %v2179_v59  ;;  %v467_v35 = vshrl.u32 %v466_v63, 23  ;;  %v313_v38 = vadd.s32 1, %v2243_v6 }
  0x4f   :  { %vm312_vm12 = vc.u32 %v2248_v13, %v2242_v4  ;;  %v374_v40 = vsub.s32 32, %v373_v16  ;;  %v2265_v61 = vand.u32 8388607, %v463_v18  ;;  %v2267_v42 = vshrl.u32 %v371_v14, 5 }
  0x50   :  { %v214_v37 = vshll.u32 %v213_v15, 30  ;;  %v314_v41 = vsel %vm312_vm12, %v313_v38, %v2243_v6  ;;  %v2269_v63 = vshll.u32 %v367_v11, 8  ;;  %v1863_v43 = vadd.s32 4294967169, %v467_v35 }
  0x51   :  { %v315_v59 = vadd.s32 %v314_v41, %v310_v56  ;;  %v237_v60 = vsub.s32 4, %v213_v15  ;;  %v376_v39 = vshll.u32 %v2102_v1, %v373_v16  ;;  %v379_v55 = vshll.u32 %v2103_v3, %v373_v16 }
  0x52   :  { %v2260_v62 = vsub.s32 %v211_v49, %v214_v37  ;;  %v377_v46 = vshrl.u32 %v2103_v3, %v374_v40  ;;  %v380_v47 = vshrl.u32 %v2104_v5, %v374_v40  ;;  %v382_v49 = vshll.u32 %v2104_v5, %v373_v16 }
  0x53   :  { %v316_v45 = vadd.s32 536870912, %v315_v59  ;;  %v383_v53 = vshrl.u32 %v2105_v7, %v374_v40  ;;  %v385_v54 = vshll.u32 %v2105_v7, %v373_v16  ;;  %v386_v52 = vshrl.u32 %v2106_v9, %v374_v40 }
  0x54   :  { %v217_v44 = vsub.s32 0, %v2260_v62  ;;  %v388_v0 = vshll.u32 %v2106_v9, %v373_v16  ;;  %v389_v57 = vshrl.u32 %v2107_v17, %v374_v40  ;;  %v471_v2 = vor.u32 8388608, %v2265_v61 }
  0x55   :  { %v317_v58 = vshrl.u32 %v316_v45, 30  ;;  %v207_v8 = vadd.s32 %v2215_v12, %v2212_v10  ;;  %v238_v56 = vsel %vm153_vm13, %v237_v60, %v213_v15  ;;  %v473_v16 = vadd.s32 1, %v1863_v43 }
  0x56   :  { %v1852_v51 = vmin.u32 %v217_v44, %v2260_v62  ;;  %v375_v35 = vshrl.u32 %v2102_v1, %v374_v40  ;;  %v378_v37 = vor.u32 %v377_v46, %v376_v39  ;;  %v381_v38 = vor.u32 %v380_v47, %v379_v55 }
  0x57   :  { %v318_v11 = vshll.u32 %v317_v58, 30  ;;  %v384_v33 = vor.u32 %v383_v53, %v382_v49  ;;  %v387_v44 = vor.u32 %v386_v52, %v385_v54  ;;  %vm391_vm0 = vcmp.lt.s32.totalorder %v2267_v42, 1 }
  0x58   :  { %v219_v14 = vclz %v1852_v51  ;;  %v341_v10 = vsub.s32 4, %v317_v58  ;;  %v390_v12 = vor.u32 %v389_v57, %v388_v0  ;;  %vm394_vm1 = vcmp.lt.s32.totalorder %v2267_v42, 4 }
  0x59   :  { %v2297_v45 = vsub.s32 %v315_v59, %v318_v11  ;;  %vm2302_vm3 = vcmp.le.f32.partialorder %v255_v36, 0.7853982  ;;  %vm392_vm4 = vcmp.lt.s32.totalorder %v2267_v42, 2  ;;  %vm393_vm5 = vcmp.lt.s32.totalorder %v2267_v42, 3 }
  0x5a   :  { %v1853_v41 = vadd.s32 4294967294, %v219_v14  ;;  %v396_v40 = vsel %vm394_vm1, %v384_v33, 2102212464  ;;  %v395_v60 = vsel %vm391_vm0, %v375_v35, %v378_v37  ;;  %v399_v39 = vsel %vm391_vm0, %v378_v37, %v381_v38 }
  0x5b   :  { %v321_v43 = vsub.s32 0, %v2297_v45  ;;  %v400_v47 = vsel %vm394_vm1, %v387_v44, 920167782  ;;  %v397_v51 = vsel %vm393_vm5, %v381_v38, %v396_v40  ;;  %v403_v54 = vsel %vm391_vm0, %v381_v38, %v384_v33 }
  0x5c   :  { %vm1854_vm2 = vcmp.lt.s32.totalorder %v1853_v41, 0  ;;  %v401_v53 = vsel %vm393_vm5, %v384_v33, %v400_v47  ;;  %v404_v57 = vsel %vm394_vm1, %v390_v12, 1326507024  ;;  %v240_v14 = vsel %vm2286_vm14, 0, %v238_v56 }
  0x5d   :  { %v222_v59 = vsel %vm1854_vm2, 0, %v1853_v41  ;;  %v1856_v49 = vmin.u32 %v321_v43, %v2297_v45  ;;  %v311_v11 = vadd.s32 %v2242_v4, %v2248_v13  ;;  %v342_v37 = vsel %vm257_vm15, %v341_v10, %v317_v58 }
  0x5e   :  { %v223_v36 = vsub.s32 32, %v222_v59  ;;  %v224_v55 = vshll.u32 %v2260_v62, %v222_v59  ;;  %v227_v46 = vsub.s32 4294967266, %v222_v59  ;;  %v402_v62 = vsel %vm392_vm4, %v399_v39, %v401_v53 }
  0x5f   :  { %v323_v35 = vclz %v1856_v49  ;;  %v405_v33 = vsel %vm393_vm5, %v387_v44, %v404_v57  ;;  %v2342_v56 = vmul.u32.u64.low %v2269_v63, %v402_v62  ;;  %v2343_v59 = vmul.u32.u64.high %v2269_v63, %v402_v62, %v2342_v56 }
  0x60   :  { %v225_v52 = vshrl.u32 %v207_v8, %v223_v36  ;;  %v228_v0 = vadd.s32 127, %v227_v46  ;;  %v398_v8 = vsel %vm392_vm4, %v395_v60, %v397_v51  ;;  %v406_v12 = vsel %vm392_vm4, %v403_v54, %v405_v33 }
  0x61   :  { %v1857_v40 = vadd.s32 4294967294, %v323_v35  ;;  %v2347_v58 = vmul.u32.u64.low %v2269_v63, %v406_v12  ;;  %v2348_v10 = vmul.u32.u64.high %v2269_v63, %v406_v12, %v2347_v58  ;;  %v244_v43 = vadd.s32 3, %v240_v14 }
  0x62   :  { %v226_v41 = vor.u32 %v225_v52, %v224_v55  ;;  %v229_v38 = vshll.u32 %v228_v0, 23  ;;  %v344_v44 = vsel %vm2302_vm3, 0, %v342_v37  ;;  %vm474_vm7 = vcmp.gt.s32.totalorder %v473_v16, 0 }
  0x63   :  { %vm1858_vm6 = vcmp.lt.s32.totalorder %v1857_v40, 0  ;;  %v414_v39 = vmul.u32 %v2269_v63, %v398_v8  ;;  %v475_v36 = vsel %vm474_vm7, %v473_v16, 0  ;;  %v417_v49 = vadd.s32 1, %v2343_v59 }
  0x64   :  { %v230_v4 = vor.u32 4788187, %v229_v38  ;;  %v233_v13 = vcvt.s32.f32 %v226_v41  ;;  %v326_v42 = vsel %vm1858_vm6, 0, %v1857_v40  ;;  %vm416_vm8 = vc.u32 %v2348_v10, %v2342_v56 }
  0x65   :  { %v327_v55 = vsub.s32 32, %v326_v42  ;;  %v328_v46 = vshll.u32 %v2297_v45, %v326_v42  ;;  %v331_v47 = vsub.s32 4294967266, %v326_v42  ;;  %v2359_v53 = vshll.u32 %v471_v2, 8 }
  0x66   :  { %v231_v60 = vand.u32 2147483647, %v230_v4  ;;  %v567_v54 = vand.u32 2147483647, %v2137_v21  ;;  %v418_v63 = vsel %vm416_vm8, %v417_v49, %v2343_v59  ;;  %v477_v16 = vand.u32 31, %v475_v36 }
  0x67   :  { %v329_v52 = vshrl.u32 %v311_v11, %v327_v55  ;;  %v332_v0 = vadd.s32 127, %v331_v47  ;;  %v2363_v45 = vand.u32 3, %v244_v43  ;;  %v348_v57 = vadd.s32 3, %v344_v44 }
  0x68   :  { %v234_v51 = vmul.f32 %v233_v13, %v231_v60  ;;  %v419_v14 = vadd.s32 %v418_v63, %v414_v39  ;;  %v2365_v41 = vshrl.u32 %v475_v36, 5  ;;  %v478_v38 = vsub.s32 32, %v477_v16 }
  0x69   :  { %v330_v35 = vor.u32 %v329_v52, %v328_v46  ;;  %v333_v37 = vshll.u32 %v332_v0, 23  ;;  %v480_v11 = vshll.u32 %v2102_v1, %v477_v16  ;;  %v483_v8 = vshll.u32 %v2103_v3, %v477_v16 }
  0x6a   :  { %v235_v62 = vxor.u32 2147483648, %v234_v51  ;;  %v420_v2 = vadd.s32 536870912, %v419_v14  ;;  %v486_v59 = vshll.u32 %v2104_v5, %v477_v16  ;;  %v481_v13 = vshrl.u32 %v2103_v3, %v478_v38 }
  0x6b   :  { %v334_v40 = vor.u32 4788187, %v333_v37  ;;  %v337_v12 = vcvt.s32.f32 %v330_v35  ;;  %v484_v58 = vshrl.u32 %v2104_v5, %v478_v38  ;;  %v487_v44 = vshrl.u32 %v2105_v7, %v478_v38 }
  0x6c   :  { %v236_v61 = vsel %vm153_vm13, %v235_v62, %v234_v51  ;;  %v421_v4 = vshrl.u32 %v420_v2, 30  ;;  %v489_v60 = vshll.u32 %v2105_v7, %v477_v16  ;;  %vm250_vm9 = vcmp.eq.s32.totalorder %v2363_v45, 2 }
  0x6d   :  { %v239_v33 = vsel %vm2286_vm14, %v2133_v19, %v236_v61  ;;  %v335_v43 = vand.u32 2147483647, %v334_v40  ;;  %v2380_v6 = vand.u32 3, %v348_v57  ;;  %vm361_vm10 = vcmp.lt.s32.totalorder %v2162_v34, 0 }
  0x6e   :  { %1989 = vcosq.f32 %v239_v33  ;;  %v422_v42 = vshll.u32 %v421_v4, 30  ;;  %vm495_vm11 = vcmp.lt.s32.totalorder %v2365_v41, 1  ;;  %vm247_vm12 = vcmp.eq.s32.totalorder %v2363_v45, 0 }
  0x6f   :  { %1991 = vsinq.f32 %v239_v33  ;;  %v338_v39 = vmul.f32 %v337_v12, %v335_v43  ;;  %v479_v36 = vshrl.u32 %v2102_v1, %v478_v38  ;;  %v490_v55 = vshrl.u32 %v2106_v9, %v478_v38 }
  0x70   :  { %v492_v46 = vshll.u32 %v2106_v9, %v477_v16  ;;  %vm246_vm13 = vcmp.lt.s32.totalorder %v2363_v45, 2  ;;  %v2389_v47 = vsub.s32 %v419_v14, %v422_v42  ;;  %v482_v49 = vor.u32 %v481_v13, %v480_v11 }
  0x71   :  { %v485_v51 = vor.u32 %v484_v58, %v483_v8  ;;  %v493_v52 = vshrl.u32 %v2107_v17, %v478_v38  ;;  %vm243_vm14 = vweird.f32 %v2133_v19  ;;  %v339_v0 = vxor.u32 2147483648, %v338_v39 }
  0x72   :  { %v488_v63 = vor.u32 %v487_v44, %v486_v59  ;;  %v491_v62 = vor.u32 %v490_v55, %v489_v60  ;;  %vm498_vm0 = vcmp.lt.s32.totalorder %v2365_v41, 4  ;;  %v425_v57 = vsub.s32 0, %v2389_v47 }
  0x73   :  { %v445_v35 = vsub.s32 4, %v421_v4  ;;  %vm497_vm1 = vcmp.lt.s32.totalorder %v2365_v41, 3  ;;  %v570_v16 = vand.u32 2139095040, %v2137_v21  ;;  %v340_v14 = vsel %vm257_vm15, %v339_v0, %v338_v39 }
  0x74   :  { %v494_v37 = vor.u32 %v493_v52, %v492_v46  ;;  %v500_v38 = vsel %vm498_vm0, %v488_v63, 2102212464  ;;  %v504_v61 = vsel %vm498_vm0, %v491_v62, 920167782  ;;  %v343_v2 = vsel %vm2302_vm3, %v2135_v20, %v340_v14 }
  0x75   :  { %v1860_v11 = vmin.u32 %v425_v57, %v2389_v47  ;;  %vm496_vm2 = vcmp.lt.s32.totalorder %v2365_v41, 2  ;;  %v503_v8 = vsel %vm495_vm11, %v482_v49, %v485_v51  ;;  %1993 = vcosq.f32 %v343_v2 }
  0x76   :  { %v499_v33 = vsel %vm495_vm11, %v479_v36, %v482_v49  ;;  %v501_v40 = vsel %vm497_vm1, %v485_v51, %v500_v38  ;;  %v505_v12 = vsel %vm497_vm1, %v488_v63, %v504_v61  ;;  %1995 = vsinq.f32 %v343_v2 }
  0x77   :  { %v415_v15 = vadd.s32 %v2342_v56, %v2348_v10  ;;  %v427_v13 = vclz %v1860_v11  ;;  %v507_v58 = vsel %vm495_vm11, %v485_v51, %v488_v63  ;;  %v446_v60 = vsel %vm361_vm10, %v445_v35, %v421_v4 }
  0x78   :  { %v1990_v59 = vpop.eup %1989  ;;  %v506_v42 = vsel %vm496_vm2, %v503_v8, %v505_v12  ;;  %v508_v39 = vsel %vm498_vm0, %v494_v37, 1326507024  ;;  %v502_v56 = vsel %vm496_vm2, %v499_v33, %v501_v40  ;;  %v571_v35 = vshrl.u32 %v570_v16, 23 }
  0x79   :  { %v1992_v43 = vpop.eup %1991  ;;  %v251_v44 = vxor.u32 2147483648, %v1990_v59  ;;  %v1861_v55 = vadd.s32 4294967294, %v427_v13  ;;  %v509_v10 = vsel %vm497_vm1, %v491_v62, %v508_v39  ;;  %v518_v41 = vmul.u32 %v2359_v53, %v502_v56 }
  0x7a   :  { %v248_v36 = vxor.u32 2147483648, %v1992_v43  ;;  %v510_v4 = vsel %vm496_vm2, %v507_v58, %v509_v10  ;;  %v2435_v49 = vmul.u32.u64.low %v2359_v53, %v506_v42  ;;  %v2436_v51 = vmul.u32.u64.high %v2359_v53, %v506_v42, %v2435_v49 }
  0x7b   :  { %v252_v46 = vsel %vm250_vm9, %v251_v44, %v1992_v43  ;;  %vm1862_vm15 = vcmp.lt.s32.totalorder %v1861_v55, 0  ;;  %v2442_v0 = vmul.u32.u64.low %v2359_v53, %v510_v4  ;;  %v2443_v63 = vmul.u32.u64.high %v2359_v53, %v510_v4, %v2442_v0 }
  0x7c   :  { %v249_v52 = vsel %vm247_vm12, %v1990_v59, %v248_v36  ;;  %v430_v57 = vsel %vm1862_vm15, 0, %v1861_v55  ;;  %vm351_vm3 = vcmp.eq.s32.totalorder %v2380_v6, 0  ;;  %vm2454_vm4 = vcmp.le.f32.partialorder %v359_v48, 0.7853982 }
  0x7d   :  { %v253_v62 = vsel %vm246_vm13, %v249_v52, %v252_v46  ;;  %v431_v37 = vsub.s32 32, %v430_v57  ;;  %v432_v38 = vshll.u32 %v2389_v47, %v430_v57  ;;  %v435_v61 = vsub.s32 4294967266, %v430_v57 }
  0x7e   :  { %v254_v14 = vsel %vm243_vm14, nan, %v253_v62  ;;  %v521_v45 = vadd.s32 1, %v2436_v51  ;;  %v1867_v11 = vadd.s32 4294967169, %v571_v35  ;;  %vm354_vm5 = vcmp.eq.s32.totalorder %v2380_v6, 2 }
  0x7f   :  { %1815 = vst [vmem:[#allocation5] sm:$0xff] %v254_v14  ;;  %v433_v19 = vshrl.u32 %v415_v15, %v431_v37  ;;  %v436_v53 = vadd.s32 127, %v435_v61  ;;  %vm520_vm6 = vc.u32 %v2443_v63, %v2435_v49  ;;  %v1994_v47 = vpop.eup %1993  ;;  %v448_v16 = vsel %vm2454_vm4, 0, %v446_v60 }
  0x80   :  { %v522_v48 = vsel %vm520_vm6, %v521_v45, %v2436_v51  ;;  %v574_v8 = vand.u32 8388607, %v567_v54  ;;  %v577_v33 = vadd.s32 1, %v1867_v11  ;;  %v1996_v40 = vpop.eup %1995  ;;  %v355_v12 = vxor.u32 2147483648, %v1994_v47 }
  0x81   :  { %v434_v59 = vor.u32 %v433_v19, %v432_v38  ;;  %v437_v13 = vshll.u32 %v436_v53, 23  ;;  %v523_v58 = vadd.s32 %v522_v48, %v518_v41  ;;  %vm347_vm7 = vweird.f32 %v2135_v20 }
  0x82   :  { %vm350_vm8 = vcmp.lt.s32.totalorder %v2380_v6, 2  ;;  %v352_v15 = vxor.u32 2147483648, %v1996_v40  ;;  %vm578_vm9 = vcmp.gt.s32.totalorder %v577_v33, 0  ;;  %v356_v43 = vsel %vm354_vm5, %v355_v12, %v1996_v40 }
  0x83   :  { %v438_v44 = vor.u32 4788187, %v437_v13  ;;  %v441_v60 = vcvt.s32.f32 %v434_v59  ;;  %v524_v42 = vadd.s32 536870912, %v523_v58  ;;  %v452_v36 = vadd.s32 3, %v448_v16 }
  0x84   :  { %v353_v39 = vsel %vm351_vm3, %v1994_v47, %v352_v15  ;;  %v575_v55 = vor.u32 8388608, %v574_v8  ;;  %v579_v56 = vsel %vm578_vm9, %v577_v33, 0  ;;  %v674_v52 = vand.u32 2139095040, %v2139_v22 }
  0x85   :  { %v357_v10 = vsel %vm350_vm8, %v353_v39, %v356_v43  ;;  %v439_v46 = vand.u32 2147483647, %v438_v44  ;;  %v2473_v4 = vshrl.u32 %v524_v42, 30  ;;  %v581_v51 = vand.u32 31, %v579_v56 }
  0x86   :  { %v358_v20 = vsel %vm347_vm7, nan, %v357_v10  ;;  %v580_v57 = vshrl.u32 %v579_v56, 5  ;;  %v2477_v41 = vand.u32 3, %v452_v36  ;;  %v2480_v14 = vshll.u32 %v575_v55, 8 }
  0x87   :  { %v442_v0 = vmul.f32 %v441_v60, %v439_v46  ;;  %v526_v62 = vshll.u32 %v2473_v4, 30  ;;  %1816 = vst [vmem:[#allocation5 + $0x8] sm:$0xff] %v358_v20  ;;  %v582_v6 = vsub.s32 32, %v581_v51  ;;  %v584_v35 = vshll.u32 %v2102_v1, %v581_v51 }
  0x88   :  { %v587_v61 = vshll.u32 %v2103_v3, %v581_v51  ;;  %v590_v45 = vshll.u32 %v2104_v5, %v581_v51  ;;  %v593_v53 = vshll.u32 %v2105_v7, %v581_v51  ;;  %v675_v47 = vshrl.u32 %v674_v52, 23 }
  0x89   :  { %v443_v37 = vxor.u32 2147483648, %v442_v0  ;;  %v2482_v38 = vsub.s32 %v523_v58, %v526_v62  ;;  %v585_v11 = vshrl.u32 %v2103_v3, %v582_v6  ;;  %v588_v19 = vshrl.u32 %v2104_v5, %v582_v6 }
  0x8a   :  { %v591_v8 = vshrl.u32 %v2105_v7, %v582_v6  ;;  %vm599_vm11 = vcmp.lt.s32.totalorder %v580_v57, 1  ;;  %v583_v40 = vshrl.u32 %v2102_v1, %v582_v6  ;;  %v594_v59 = vshrl.u32 %v2106_v9, %v582_v6 }
  0x8b   :  { %v444_v16 = vsel %vm361_vm10, %v443_v37, %v442_v0  ;;  %v529_v48 = vsub.s32 0, %v2482_v38  ;;  %v586_v12 = vor.u32 %v585_v11, %v584_v35  ;;  %v589_v58 = vor.u32 %v588_v19, %v587_v61 }
  0x8c   :  { %v447_v33 = vsel %vm2454_vm4, %v2162_v34, %v444_v16  ;;  %v592_v15 = vor.u32 %v591_v8, %v590_v45  ;;  %v595_v43 = vor.u32 %v594_v59, %v593_v53  ;;  %v596_v44 = vshll.u32 %v2106_v9, %v581_v51 }
  0x8d   :  { %1997 = vcosq.f32 %v447_v33  ;;  %v1864_v13 = vmin.u32 %v529_v48, %v2482_v38  ;;  %v597_v60 = vshrl.u32 %v2107_v17, %v582_v6  ;;  %vm465_vm10 = vcmp.lt.s32.totalorder %v2173_v50, 0 }
  0x8e   :  { %1999 = vsinq.f32 %v447_v33  ;;  %v519_v2 = vadd.s32 %v2435_v49, %v2443_v63  ;;  %v671_v39 = vand.u32 2147483647, %v2139_v22  ;;  %v1871_v36 = vadd.s32 4294967169, %v675_v47 }
  0x8f   :  { %v531_v42 = vclz %v1864_v13  ;;  %vm455_vm12 = vcmp.eq.s32.totalorder %v2477_v41, 0  ;;  %v598_v55 = vor.u32 %v597_v60, %v596_v44  ;;  %vm600_vm13 = vcmp.lt.s32.totalorder %v580_v57, 2 }
  0x90   :  { %vm601_vm14 = vcmp.lt.s32.totalorder %v580_v57, 3  ;;  %vm602_vm0 = vcmp.lt.s32.totalorder %v580_v57, 4  ;;  %vm454_vm1 = vcmp.lt.s32.totalorder %v2477_v41, 2  ;;  %v603_v10 = vsel %vm599_vm11, %v583_v40, %v586_v12 }
  0x91   :  { %v1865_v56 = vadd.s32 4294967294, %v531_v42  ;;  %v604_v46 = vsel %vm602_vm0, %v592_v15, 2102212464  ;;  %v607_v20 = vsel %vm599_vm11, %v586_v12, %v589_v58  ;;  %vm451_vm2 = vweird.f32 %v2162_v34 }
  0x92   :  { %v605_v49 = vsel %vm601_vm14, %v589_v58, %v604_v46  ;;  %v608_v63 = vsel %vm602_vm0, %v595_v43, 920167782  ;;  %v611_v51 = vsel %vm599_vm11, %v589_v58, %v592_v15  ;;  %v612_v52 = vsel %vm602_vm0, %v598_v55, 1326507024 }
  0x93   :  { %vm1866_vm15 = vcmp.lt.s32.totalorder %v1865_v56, 0  ;;  %v549_v0 = vsub.s32 4, %v2473_v4  ;;  %v609_v62 = vsel %vm601_vm14, %v592_v15, %v608_v63  ;;  %v613_v6 = vsel %vm601_vm14, %v595_v43, %v612_v52 }
  0x94   :  { %v534_v35 = vsel %vm1866_vm15, 0, %v1865_v56  ;;  %v606_v37 = vsel %vm600_vm13, %v603_v10, %v605_v49  ;;  %v610_v61 = vsel %vm600_vm13, %v607_v20, %v609_v62  ;;  %v614_v45 = vsel %vm600_vm13, %v611_v51, %v613_v6 }
  0x95   :  { %v535_v11 = vsub.s32 32, %v534_v35  ;;  %v536_v19 = vshll.u32 %v2482_v38, %v534_v35  ;;  %v539_v53 = vsub.s32 4294967266, %v534_v35  ;;  %v681_v47 = vadd.s32 1, %v1871_v36 }
  0x96   :  { %v2517_v16 = vmul.u32.u64.low %v2480_v14, %v614_v45  ;;  %v2518_v48 = vmul.u32.u64.high %v2480_v14, %v614_v45, %v2517_v16  ;;  %v2521_v8 = vmul.u32.u64.low %v2480_v14, %v610_v61  ;;  %v2522_v33 = vmul.u32.u64.high %v2480_v14, %v610_v61, %v2521_v8 }
  0x97   :  { %v1998_v40 = vpop.eup %1997  ;;  %vm458_vm3 = vcmp.eq.s32.totalorder %v2477_v41, 2  ;;  %v537_v12 = vshrl.u32 %v519_v2, %v535_v11  ;;  %v540_v57 = vadd.s32 127, %v539_v53  ;;  %vm682_vm4 = vcmp.gt.s32.totalorder %v681_v47, 0 }
  0x98   :  { %v2000_v59 = vpop.eup %1999  ;;  %v459_v13 = vxor.u32 2147483648, %v1998_v40  ;;  %v550_v38 = vsel %vm465_vm10, %v549_v0, %v2473_v4  ;;  %v678_v58 = vand.u32 8388607, %v671_v39  ;;  %v683_v15 = vsel %vm682_vm4, %v681_v47, 0 }
  0x99   :  { %v456_v43 = vxor.u32 2147483648, %v2000_v59  ;;  %v538_v44 = vor.u32 %v537_v12, %v536_v19  ;;  %v541_v60 = vshll.u32 %v540_v57, 23  ;;  %v622_v42 = vmul.u32 %v2480_v14, %v606_v37 }
  0x9a   :  { %v460_v36 = vsel %vm458_vm3, %v459_v13, %v2000_v59  ;;  %vm2534_vm5 = vcmp.le.f32.partialorder %v463_v18, 0.7853982  ;;  %vm624_vm6 = vc.u32 %v2518_v48, %v2521_v8  ;;  %v625_v4 = vadd.s32 1, %v2522_v33 }
  0x9b   :  { %v457_v55 = vsel %vm455_vm12, %v1998_v40, %v456_v43  ;;  %v542_v56 = vor.u32 4788187, %v541_v60  ;;  %v545_v10 = vcvt.s32.f32 %v538_v44  ;;  %v685_v46 = vand.u32 31, %v683_v15 }
  0x9c   :  { %v461_v14 = vsel %vm454_vm1, %v457_v55, %v460_v36  ;;  %v552_v18 = vsel %vm2534_vm5, 0, %v550_v38  ;;  %v626_v20 = vsel %vm624_vm6, %v625_v4, %v2522_v33  ;;  %v679_v49 = vor.u32 8388608, %v678_v58 }
  0x9d   :  { %v462_v63 = vsel %vm451_vm2, nan, %v461_v14  ;;  %v543_v51 = vand.u32 2147483647, %v542_v56  ;;  %v627_v52 = vadd.s32 %v626_v20, %v622_v42  ;;  %v686_v0 = vsub.s32 32, %v685_v46 }
  0x9e   :  { %v684_v62 = vshrl.u32 %v683_v15, 5  ;;  %v688_v6 = vshll.u32 %v2102_v1, %v685_v46  ;;  %v691_v35 = vshll.u32 %v2103_v3, %v685_v46  ;;  %v697_v41 = vshll.u32 %v2105_v7, %v685_v46  ;;  %1817 = vst [vmem:[#allocation5 + $0x10] sm:$0xff] %v462_v63 }
  0x9f   :  { %v546_v37 = vmul.f32 %v545_v10, %v543_v51  ;;  %v628_v61 = vadd.s32 536870912, %v627_v52  ;;  %v689_v45 = vshrl.u32 %v2103_v3, %v686_v0  ;;  %v694_v11 = vshll.u32 %v2104_v5, %v685_v46 }
  0xa0   :  { %v692_v34 = vshrl.u32 %v2104_v5, %v686_v0  ;;  %v695_v19 = vshrl.u32 %v2105_v7, %v686_v0  ;;  %v698_v53 = vshrl.u32 %v2106_v9, %v686_v0  ;;  %v700_v47 = vshll.u32 %v2106_v9, %v685_v46 }
  0xa1   :  { %v547_v16 = vxor.u32 2147483648, %v546_v37  ;;  %v629_v33 = vshrl.u32 %v628_v61, 30  ;;  %v690_v40 = vor.u32 %v689_v45, %v688_v6  ;;  %v701_v12 = vshrl.u32 %v2107_v17, %v686_v0 }
  0xa2   :  { %v556_v57 = vadd.s32 3, %v552_v18  ;;  %v693_v59 = vor.u32 %v692_v34, %v691_v35  ;;  %v699_v13 = vor.u32 %v698_v53, %v697_v41  ;;  %vm703_vm7 = vcmp.lt.s32.totalorder %v684_v62, 1 }
  0xa3   :  { %v548_v38 = vsel %vm465_vm10, %v547_v16, %v546_v37  ;;  %v630_v58 = vshll.u32 %v629_v33, 30  ;;  %v696_v15 = vor.u32 %v695_v19, %v694_v11  ;;  %vm704_vm8 = vcmp.lt.s32.totalorder %v684_v62, 2 }
  0xa4   :  { %v551_v43 = vsel %vm2534_vm5, %v2173_v50, %v548_v38  ;;  %v702_v44 = vor.u32 %v701_v12, %v700_v47  ;;  %vm705_vm9 = vcmp.lt.s32.totalorder %v684_v62, 3  ;;  %vm706_vm11 = vcmp.lt.s32.totalorder %v684_v62, 4 }
  0xa5   :  { %2001 = vcosq.f32 %v551_v43  ;;  %v2565_v60 = vsub.s32 %v627_v52, %v630_v58  ;;  %v687_v42 = vshrl.u32 %v2102_v1, %v686_v0  ;;  %v711_v36 = vsel %vm703_vm7, %v690_v40, %v693_v59 }
  0xa6   :  { %2003 = vsinq.f32 %v551_v43  ;;  %v708_v4 = vsel %vm706_vm11, %v696_v15, 2102212464  ;;  %v712_v55 = vsel %vm706_vm11, %v699_v13, 920167782  ;;  %v719_v56 = vshll.u32 %v679_v49, 8 }
  0xa7   :  { %v633_v10 = vsub.s32 0, %v2565_v60  ;;  %v653_v46 = vsub.s32 4, %v629_v33  ;;  %v713_v2 = vsel %vm705_vm9, %v696_v15, %v712_v55  ;;  %v557_v14 = vand.u32 3, %v556_v57 }
  0xa8   :  { %v714_v18 = vsel %vm704_vm8, %v711_v36, %v713_v2  ;;  %v715_v20 = vsel %vm703_vm7, %v693_v59, %v696_v15  ;;  %v716_v63 = vsel %vm706_vm11, %v702_v44, 1326507024  ;;  %v707_v52 = vsel %vm703_vm7, %v687_v42, %v690_v40 }
  0xa9   :  { %v1868_v51 = vmin.u32 %v633_v10, %v2565_v60  ;;  %v709_v0 = vsel %vm705_vm9, %v693_v59, %v708_v4  ;;  %v717_v6 = vsel %vm705_vm9, %v699_v13, %v716_v63  ;;  %vm569_vm10 = vcmp.lt.s32.totalorder %v2137_v21, 0 }
  0xaa   :  { %v718_v49 = vsel %vm704_vm8, %v715_v20, %v717_v6  ;;  %v2579_v35 = vmul.u32.u64.low %v719_v56, %v714_v18  ;;  %v2580_v41 = vmul.u32.u64.high %v719_v56, %v714_v18, %v2579_v35  ;;  %v654_v61 = vsel %vm569_vm10, %v653_v46, %v629_v33 }
  0xab   :  { %v635_v37 = vclz %v1868_v51  ;;  %v775_v45 = vand.u32 2147483647, %v2141_v23  ;;  %v710_v11 = vsel %vm704_vm8, %v707_v52, %v709_v0  ;;  %v778_v53 = vand.u32 2139095040, %v2141_v23 }
  0xac   :  { %v2586_v34 = vmul.u32.u64.low %v719_v56, %v718_v49  ;;  %v2587_v19 = vmul.u32.u64.high %v719_v56, %v718_v49, %v2586_v34  ;;  %vm555_vm12 = vweird.f32 %v2173_v50  ;;  %vm558_vm13 = vcmp.lt.s32.totalorder %v557_v14, 2 }
  0xad   :  { %vm2593_vm14 = vcmp.le.f32.partialorder %v567_v54, 0.7853982  ;;  %v1869_v16 = vadd.s32 4294967294, %v635_v37  ;;  %vm559_vm0 = vcmp.eq.s32.totalorder %v557_v14, 0  ;;  %vm562_vm1 = vcmp.eq.s32.totalorder %v557_v14, 2 }
  0xae   :  { %v729_v62 = vadd.s32 1, %v2580_v41  ;;  %v779_v33 = vshrl.u32 %v778_v53, 23  ;;  %v623_v12 = vadd.s32 %v2521_v8, %v2518_v48  ;;  %v656_v57 = vsel %vm2593_vm14, 0, %v654_v61 }
  0xaf   :  { %v2002_v40 = vpop.eup %2001  ;;  %vm1870_vm2 = vcmp.lt.s32.totalorder %v1869_v16, 0  ;;  %v726_v59 = vmul.u32 %v719_v56, %v710_v11  ;;  %vm728_vm15 = vc.u32 %v2587_v19, %v2579_v35  ;;  %v782_v58 = vand.u32 8388607, %v775_v45 }
  0xb0   :  { %v2004_v13 = vpop.eup %2003  ;;  %v563_v54 = vxor.u32 2147483648, %v2002_v40  ;;  %v638_v38 = vsel %vm1870_vm2, 0, %v1869_v16  ;;  %v730_v8 = vsel %vm728_vm15, %v729_v62, %v2580_v41  ;;  %v1875_v36 = vadd.s32 4294967169, %v779_v33 }
  0xb1   :  { %v560_v15 = vxor.u32 2147483648, %v2004_v13  ;;  %v639_v43 = vsub.s32 32, %v638_v38  ;;  %v640_v44 = vshll.u32 %v2565_v60, %v638_v38  ;;  %v643_v42 = vsub.s32 4294967266, %v638_v38 }
  0xb2   :  { %v564_v48 = vsel %vm562_vm1, %v563_v54, %v2004_v13  ;;  %v882_v4 = vand.u32 2139095040, %v2143_v24  ;;  %v731_v46 = vadd.s32 %v730_v8, %v726_v59  ;;  %v660_v18 = vadd.s32 3, %v656_v57 }
  0xb3   :  { %v561_v55 = vsel %vm559_vm0, %v2002_v40, %v560_v15  ;;  %v641_v56 = vshrl.u32 %v623_v12, %v639_v43  ;;  %v644_v10 = vadd.s32 127, %v643_v42  ;;  %v785_v20 = vadd.s32 1, %v1875_v36 }
  0xb4   :  { %v565_v2 = vsel %vm558_vm13, %v561_v55, %v564_v48  ;;  %v879_v63 = vand.u32 2147483647, %v2143_v24  ;;  %v732_v0 = vadd.s32 536870912, %v731_v46  ;;  %v783_v6 = vor.u32 8388608, %v782_v58 }
  0xb5   :  { %v566_v60 = vsel %vm555_vm12, nan, %v565_v2  ;;  %v642_v51 = vor.u32 %v641_v56, %v640_v44  ;;  %v645_v52 = vshll.u32 %v644_v10, 23  ;;  %vm786_vm3 = vcmp.gt.s32.totalorder %v785_v20, 0 }
  0xb6   :  { %v883_v49 = vshrl.u32 %v882_v4, 23  ;;  %1818 = vst [vmem:[#allocation5 + $0x18] sm:$0xff] %v566_v60  ;;  %v2614_v61 = vshrl.u32 %v732_v0, 30  ;;  %v787_v14 = vsel %vm786_vm3, %v785_v20, 0  ;;  %v2616_v53 = vand.u32 3, %v660_v18 }
  0xb7   :  { %v646_v41 = vor.u32 4788187, %v645_v52  ;;  %v649_v37 = vcvt.s32.f32 %v642_v51  ;;  %v789_v11 = vand.u32 31, %v787_v14  ;;  %v2621_v50 = vand.u32 8388607, %v879_v63 }
  0xb8   :  { %v734_v16 = vshll.u32 %v2614_v61, 30  ;;  %v727_v62 = vadd.s32 %v2579_v35, %v2587_v19  ;;  %v2624_v40 = vshll.u32 %v783_v6, 8  ;;  %v1879_v12 = vadd.s32 4294967169, %v883_v49 }
  0xb9   :  { %v647_v34 = vand.u32 2147483647, %v646_v41  ;;  %v790_v33 = vsub.s32 32, %v789_v11  ;;  %v792_v13 = vshll.u32 %v2102_v1, %v789_v11  ;;  %v795_v54 = vshll.u32 %v2103_v3, %v789_v11 }
  0xba   :  { %v2626_v59 = vsub.s32 %v731_v46, %v734_v16  ;;  %v798_v15 = vshll.u32 %v2104_v5, %v789_v11  ;;  %v801_v43 = vshll.u32 %v2105_v7, %v789_v11  ;;  %v788_v44 = vshrl.u32 %v787_v14, 5 }
  0xbb   :  { %v650_v57 = vmul.f32 %v649_v37, %v647_v34  ;;  %v793_v38 = vshrl.u32 %v2103_v3, %v790_v33  ;;  %v796_v58 = vshrl.u32 %v2104_v5, %v790_v33  ;;  %v799_v42 = vshrl.u32 %v2105_v7, %v790_v33 }
  0xbc   :  { %v737_v19 = vsub.s32 0, %v2626_v59  ;;  %v791_v48 = vshrl.u32 %v2102_v1, %v790_v33  ;;  %v802_v8 = vshrl.u32 %v2106_v9, %v790_v33  ;;  %v804_v36 = vshll.u32 %v2106_v9, %v789_v11 }
  0xbd   :  { %v651_v35 = vxor.u32 2147483648, %v650_v57  ;;  %v887_v4 = vor.u32 8388608, %v2621_v50  ;;  %v794_v10 = vor.u32 %v793_v38, %v792_v13  ;;  %v797_v46 = vor.u32 %v796_v58, %v795_v54 }
  0xbe   :  { %v1872_v56 = vmin.u32 %v737_v19, %v2626_v59  ;;  %v800_v18 = vor.u32 %v799_v42, %v798_v15  ;;  %v803_v20 = vor.u32 %v802_v8, %v801_v43  ;;  %v805_v60 = vshrl.u32 %v2107_v17, %v790_v33 }
  0xbf   :  { %v652_v55 = vsel %vm569_vm10, %v651_v35, %v650_v57  ;;  %vm673_vm4 = vcmp.lt.s32.totalorder %v2139_v22, 0  ;;  %vm807_vm5 = vcmp.lt.s32.totalorder %v788_v44, 1  ;;  %v889_v52 = vadd.s32 1, %v1879_v12 }
  0xc0   :  { %v655_v2 = vsel %vm2593_vm14, %v2137_v21, %v652_v55  ;;  %v739_v51 = vclz %v1872_v56  ;;  %v757_v0 = vsub.s32 4, %v2614_v61  ;;  %v806_v6 = vor.u32 %v805_v60, %v804_v36 }
  0xc1   :  { %2005 = vcosq.f32 %v655_v2  ;;  %vm808_vm6 = vcmp.lt.s32.totalorder %v788_v44, 2  ;;  %vm809_vm7 = vcmp.lt.s32.totalorder %v788_v44, 3  ;;  %vm810_vm8 = vcmp.lt.s32.totalorder %v788_v44, 4 }
  0xc2   :  { %2007 = vsinq.f32 %v655_v2  ;;  %v1873_v49 = vadd.s32 4294967294, %v739_v51  ;;  %v811_v47 = vsel %vm807_vm5, %v791_v48, %v794_v10  ;;  %v812_v41 = vsel %vm810_vm8, %v800_v18, 2102212464 }
  0xc3   :  { %v815_v37 = vsel %vm807_vm5, %v794_v10, %v797_v46  ;;  %v816_v14 = vsel %vm810_vm8, %v803_v20, 920167782  ;;  %v819_v11 = vsel %vm807_vm5, %v797_v46, %v800_v18  ;;  %vm2651_vm9 = vcmp.le.f32.partialorder %v671_v39, 0.7853982 }
  0xc4   :  { %vm1874_vm11 = vcmp.lt.s32.totalorder %v1873_v49, 0  ;;  %v813_v16 = vsel %vm809_vm7, %v797_v46, %v812_v41  ;;  %v817_v50 = vsel %vm809_vm7, %v800_v18, %v816_v14  ;;  %v820_v33 = vsel %vm810_vm8, %v806_v6, 1326507024 }
  0xc5   :  { %vm659_vm10 = vweird.f32 %v2137_v21  ;;  %v742_v12 = vsel %vm1874_vm11, 0, %v1873_v49  ;;  %v814_v57 = vsel %vm808_vm6, %v811_v47, %v813_v16  ;;  %v818_v13 = vsel %vm808_vm6, %v815_v37, %v817_v50 }
  0xc6   :  { %v821_v54 = vsel %vm809_vm7, %v803_v20, %v820_v33  ;;  %v743_v38 = vsub.s32 32, %v742_v12  ;;  %v744_v39 = vshll.u32 %v2626_v59, %v742_v12  ;;  %v747_v58 = vsub.s32 4294967266, %v742_v12 }
  0xc7   :  { %v822_v15 = vsel %vm808_vm6, %v819_v11, %v821_v54  ;;  %v2668_v19 = vmul.u32.u64.low %v2624_v40, %v818_v13  ;;  %v2669_v42 = vmul.u32.u64.high %v2624_v40, %v818_v13, %v2668_v19  ;;  %vm662_vm12 = vcmp.lt.s32.totalorder %v2616_v53, 2 }
  0xc8   :  { %v2664_v43 = vmul.u32.u64.low %v2624_v40, %v822_v15  ;;  %v2665_v35 = vmul.u32.u64.high %v2624_v40, %v822_v15, %v2664_v43  ;;  %v745_v48 = vshrl.u32 %v727_v62, %v743_v38  ;;  %v748_v8 = vadd.s32 127, %v747_v58 }
  0xc9   :  { %vm890_vm13 = vcmp.gt.s32.totalorder %v889_v52, 0  ;;  %vm663_vm14 = vcmp.eq.s32.totalorder %v2616_v53, 0  ;;  %vm666_vm0 = vcmp.eq.s32.totalorder %v2616_v53, 2  ;;  %v758_v59 = vsel %vm673_vm4, %v757_v0, %v2614_v61 }
  0xca   :  { %v891_v44 = vsel %vm890_vm13, %v889_v52, 0  ;;  %v746_v55 = vor.u32 %v745_v48, %v744_v39  ;;  %v749_v56 = vshll.u32 %v748_v8, 23  ;;  %v830_v10 = vmul.u32 %v2624_v40, %v814_v57 }
  0xcb   :  { %v2006_v36 = vpop.eup %2005  ;;  %v893_v46 = vand.u32 31, %v891_v44  ;;  %vm832_vm1 = vc.u32 %v2665_v35, %v2668_v19  ;;  %v833_v62 = vadd.s32 1, %v2669_v42  ;;  %v2682_v20 = vshll.u32 %v887_v4, 8 }
  0xcc   :  { %v2008_v2 = vpop.eup %2007  ;;  %v667_v18 = vxor.u32 2147483648, %v2006_v36  ;;  %v750_v51 = vor.u32 4788187, %v749_v56  ;;  %v753_v6 = vcvt.s32.f32 %v746_v55  ;;  %v760_v40 = vsel %vm2651_vm9, 0, %v758_v59 }
  0xcd   :  { %v664_v60 = vxor.u32 2147483648, %v2008_v2  ;;  %v894_v61 = vsub.s32 32, %v893_v46  ;;  %v834_v0 = vsel %vm832_vm1, %v833_v62, %v2669_v42  ;;  %v983_v49 = vand.u32 2147483647, %v2145_v25 }
  0xce   :  { %v668_v52 = vsel %vm666_vm0, %v667_v18, %v2008_v2  ;;  %v751_v41 = vand.u32 2147483647, %v750_v51  ;;  %v835_v4 = vadd.s32 %v834_v0, %v830_v10  ;;  %v896_v37 = vshll.u32 %v2102_v1, %v893_v46 }
  0xcf   :  { %v665_v47 = vsel %vm663_vm14, %v2006_v36, %v664_v60  ;;  %v897_v11 = vshrl.u32 %v2103_v3, %v894_v61  ;;  %v899_v16 = vshll.u32 %v2103_v3, %v893_v46  ;;  %v900_v50 = vshrl.u32 %v2104_v5, %v894_v61 }
  0xd0   :  { %v669_v14 = vsel %vm662_vm12, %v665_v47, %v668_v52  ;;  %v754_v12 = vmul.f32 %v753_v6, %v751_v41  ;;  %v836_v57 = vadd.s32 536870912, %v835_v4  ;;  %v892_v13 = vshrl.u32 %v891_v44, 5 }
  0xd1   :  { %v670_v33 = vsel %vm659_vm10, nan, %v669_v14  ;;  %v902_v54 = vshll.u32 %v2104_v5, %v893_v46  ;;  %v903_v38 = vshrl.u32 %v2105_v7, %v894_v61  ;;  %v905_v39 = vshll.u32 %v2105_v7, %v893_v46 }
  0xd2   :  { %v906_v53 = vshrl.u32 %v2106_v9, %v894_v61  ;;  %1819 = vst [vmem:[#allocation5 + $0x20] sm:$0xff] %v670_v33  ;;  %v755_v58 = vxor.u32 2147483648, %v754_v12  ;;  %v764_v15 = vadd.s32 3, %v760_v40  ;;  %v837_v43 = vshrl.u32 %v836_v57, 30 }
  0xd3   :  { %v908_v42 = vshll.u32 %v2106_v9, %v893_v46  ;;  %vm777_vm2 = vcmp.lt.s32.totalorder %v2141_v23, 0  ;;  %v895_v21 = vshrl.u32 %v2102_v1, %v894_v61  ;;  %v898_v48 = vor.u32 %v897_v11, %v896_v37 }
  0xd4   :  { %v901_v8 = vor.u32 %v900_v50, %v899_v16  ;;  %v909_v59 = vshrl.u32 %v2107_v17, %v894_v61  ;;  %v756_v44 = vsel %vm673_vm4, %v755_v58, %v754_v12  ;;  %v838_v36 = vshll.u32 %v837_v43, 30 }
  0xd5   :  { %v907_v55 = vor.u32 %v906_v53, %v905_v39  ;;  %vm911_vm15 = vcmp.lt.s32.totalorder %v892_v13, 1  ;;  %v759_v56 = vsel %vm2651_vm9, %v2139_v22, %v756_v44  ;;  %v904_v10 = vor.u32 %v903_v38, %v902_v54 }
  0xd6   :  { %v910_v46 = vor.u32 %v909_v59, %v908_v42  ;;  %vm914_vm3 = vcmp.lt.s32.totalorder %v892_v13, 4  ;;  %2009 = vcosq.f32 %v759_v56  ;;  %v2713_v2 = vsub.s32 %v835_v4, %v838_v36 }
  0xd7   :  { %vm913_vm5 = vcmp.lt.s32.totalorder %v892_v13, 3  ;;  %v986_v18 = vand.u32 2139095040, %v2145_v25  ;;  %2011 = vsinq.f32 %v759_v56  ;;  %vm912_vm6 = vcmp.lt.s32.totalorder %v892_v13, 2 }
  0xd8   :  { %v916_v62 = vsel %vm914_vm3, %v904_v10, 2102212464  ;;  %v919_v60 = vsel %vm911_vm15, %v898_v48, %v901_v8  ;;  %v765_v51 = vand.u32 3, %v764_v15  ;;  %v841_v6 = vsub.s32 0, %v2713_v2 }
  0xd9   :  { %v861_v34 = vsub.s32 4, %v837_v43  ;;  %v920_v61 = vsel %vm914_vm3, %v907_v55, 920167782  ;;  %v915_v52 = vsel %vm911_vm15, %v895_v21, %v898_v48  ;;  %v923_v0 = vsel %vm911_vm15, %v901_v8, %v904_v10 }
  0xda   :  { %v921_v40 = vsel %vm913_vm5, %v904_v10, %v920_v61  ;;  %v924_v47 = vsel %vm914_vm3, %v910_v46, 1326507024  ;;  %v1876_v41 = vmin.u32 %v841_v6, %v2713_v2  ;;  %v917_v4 = vsel %vm913_vm5, %v901_v8, %v916_v62 }
  0xdb   :  { %v922_v37 = vsel %vm912_vm6, %v919_v60, %v921_v40  ;;  %v925_v14 = vsel %vm913_vm5, %v907_v55, %v924_v47  ;;  %v987_v33 = vshrl.u32 %v986_v18, 23  ;;  %vm763_vm4 = vweird.f32 %v2139_v22 }
  0xdc   :  { %v926_v11 = vsel %vm912_vm6, %v923_v0, %v925_v14  ;;  %v2730_v16 = vmul.u32.u64.low %v2682_v20, %v922_v37  ;;  %v2731_v50 = vmul.u32.u64.high %v2682_v20, %v922_v37, %v2730_v16  ;;  %vm2737_vm7 = vcmp.le.f32.partialorder %v775_v45, 0.7853982 }
  0xdd   :  { %v843_v57 = vclz %v1876_v41  ;;  %v862_v54 = vsel %vm777_vm2, %v861_v34, %v837_v43  ;;  %v918_v38 = vsel %vm912_vm6, %v915_v52, %v917_v4  ;;  %v1883_v58 = vadd.s32 4294967169, %v987_v33 }
  0xde   :  { %v2745_v39 = vmul.u32.u64.low %v2682_v20, %v926_v11  ;;  %v2746_v53 = vmul.u32.u64.high %v2682_v20, %v926_v11, %v2745_v39  ;;  %vm766_vm8 = vcmp.lt.s32.totalorder %v765_v51, 2  ;;  %vm767_vm9 = vcmp.eq.s32.totalorder %v765_v51, 0 }
  0xdf   :  { %v1877_v15 = vadd.s32 4294967294, %v843_v57  ;;  %v1090_v42 = vand.u32 2139095040, %v2147_v26  ;;  %vm770_vm11 = vcmp.eq.s32.totalorder %v765_v51, 2  ;;  %v937_v45 = vadd.s32 1, %v2731_v50 }
  0xe0   :  { %v990_v21 = vand.u32 8388607, %v983_v49  ;;  %v993_v48 = vadd.s32 1, %v1883_v58  ;;  %v2010_v43 = vpop.eup %2009  ;;  %v831_v13 = vadd.s32 %v2668_v19, %v2665_v35  ;;  %v864_v8 = vsel %vm2737_vm7, 0, %v862_v54 }
  0xe1   :  { %vm1878_vm10 = vcmp.lt.s32.totalorder %v1877_v15, 0  ;;  %v934_v59 = vmul.u32 %v2682_v20, %v918_v38  ;;  %v2012_v44 = vpop.eup %2011  ;;  %v771_v36 = vxor.u32 2147483648, %v2010_v43  ;;  %vm936_vm12 = vc.u32 %v2746_v53, %v2730_v16 }
  0xe2   :  { %v846_v55 = vsel %vm1878_vm10, 0, %v1877_v15  ;;  %v1091_v56 = vshrl.u32 %v1090_v42, 23  ;;  %v768_v10 = vxor.u32 2147483648, %v2012_v44  ;;  %v868_v19 = vadd.s32 3, %v864_v8 }
  0xe3   :  { %v847_v46 = vsub.s32 32, %v846_v55  ;;  %v848_v18 = vshll.u32 %v2713_v2, %v846_v55  ;;  %v851_v62 = vsub.s32 4294967266, %v846_v55  ;;  %v772_v35 = vsel %vm770_vm11, %v771_v36, %v2012_v44 }
  0xe4   :  { %v938_v60 = vsel %vm936_vm12, %v937_v45, %v2731_v50  ;;  %vm994_vm13 = vcmp.gt.s32.totalorder %v993_v48, 0  ;;  %v769_v20 = vsel %vm767_vm9, %v2010_v43, %v768_v10  ;;  %v1087_v0 = vand.u32 2147483647, %v2147_v26 }
  0xe5   :  { %v849_v6 = vshrl.u32 %v831_v13, %v847_v46  ;;  %v852_v34 = vadd.s32 127, %v851_v62  ;;  %v939_v61 = vadd.s32 %v938_v60, %v934_v59  ;;  %v773_v52 = vsel %vm766_vm8, %v769_v20, %v772_v35 }
  0xe6   :  { %v995_v40 = vsel %vm994_vm13, %v993_v48, 0  ;;  %v1887_v47 = vadd.s32 4294967169, %v1091_v56  ;;  %v774_v2 = vsel %vm763_vm4, nan, %v773_v52  ;;  %v2767_v14 = vand.u32 3, %v868_v19 }
  0xe7   :  { %v850_v41 = vor.u32 %v849_v6, %v848_v18  ;;  %v853_v4 = vshll.u32 %v852_v34, 23  ;;  %v940_v37 = vadd.s32 536870912, %v939_v61  ;;  %v997_v11 = vand.u32 31, %v995_v40  ;;  %1820 = vst [vmem:[#allocation5 + $0x28] sm:$0xff] %v774_v2 }
  0xe8   :  { %v991_v51 = vor.u32 8388608, %v990_v21  ;;  %v2771_v54 = vshrl.u32 %v995_v40, 5  ;;  %v2775_v39 = vand.u32 8388607, %v1087_v0  ;;  %v1097_v22 = vadd.s32 1, %v1887_v47 }
  0xe9   :  { %v854_v50 = vor.u32 4788187, %v853_v4  ;;  %v857_v33 = vcvt.s32.f32 %v850_v41  ;;  %v2769_v57 = vshrl.u32 %v940_v37, 30  ;;  %v998_v38 = vsub.s32 32, %v997_v11 }
  0xea   :  { %v1000_v42 = vshll.u32 %v2102_v1, %v997_v11  ;;  %v1003_v45 = vshll.u32 %v2103_v3, %v997_v11  ;;  %v1006_v21 = vshll.u32 %v2104_v5, %v997_v11  ;;  %v1009_v44 = vshll.u32 %v2105_v7, %v997_v11 }
  0xeb   :  { %v855_v58 = vand.u32 2147483647, %v854_v50  ;;  %v942_v15 = vshll.u32 %v2769_v57, 30  ;;  %v1001_v48 = vshrl.u32 %v2103_v3, %v998_v38  ;;  %v1004_v43 = vshrl.u32 %v2104_v5, %v998_v38 }
  0xec   :  { %v1007_v13 = vshrl.u32 %v2105_v7, %v998_v38  ;;  %v1010_v36 = vshrl.u32 %v2106_v9, %v998_v38  ;;  %v935_v55 = vadd.s32 %v2730_v16, %v2746_v53  ;;  %v2790_v56 = vshll.u32 %v991_v51, 8 }
  0xed   :  { %v858_v8 = vmul.f32 %v857_v33, %v855_v58  ;;  %v2784_v59 = vsub.s32 %v939_v61, %v942_v15  ;;  %v1095_v10 = vor.u32 8388608, %v2775_v39  ;;  %vm1098_vm14 = vcmp.gt.s32.totalorder %v1097_v22, 0 }
  0xee   :  { %v999_v62 = vshrl.u32 %v2102_v1, %v998_v38  ;;  %v1002_v35 = vor.u32 %v1001_v48, %v1000_v42  ;;  %v1005_v19 = vor.u32 %v1004_v43, %v1003_v45  ;;  %v1008_v60 = vor.u32 %v1007_v13, %v1006_v21 }
  0xef   :  { %v859_v46 = vxor.u32 2147483648, %v858_v8  ;;  %v945_v18 = vsub.s32 0, %v2784_v59  ;;  %v1012_v20 = vshll.u32 %v2106_v9, %v997_v11  ;;  %v1013_v6 = vshrl.u32 %v2107_v17, %v998_v38 }
  0xf0   :  { %vm881_vm0 = vcmp.lt.s32.totalorder %v2143_v24, 0  ;;  %v1011_v34 = vor.u32 %v1010_v36, %v1009_v44  ;;  %vm1015_vm1 = vcmp.lt.s32.totalorder %v2771_v54, 1  ;;  %vm1018_vm15 = vcmp.lt.s32.totalorder %v2771_v54, 4 }
  0xf1   :  { %v860_v16 = vsel %vm777_vm2, %v859_v46, %v858_v8  ;;  %v1880_v53 = vmin.u32 %v945_v18, %v2784_v59  ;;  %v1014_v52 = vor.u32 %v1013_v6, %v1012_v20  ;;  %v1099_v40 = vsel %vm1098_vm14, %v1097_v22, 0 }
  0xf2   :  { %v863_v61 = vsel %vm2737_vm7, %v2141_v23, %v860_v16  ;;  %vm1017_vm2 = vcmp.lt.s32.totalorder %v2771_v54, 3  ;;  %v1019_v2 = vsel %vm1015_vm1, %v999_v62, %v1002_v35  ;;  %vm1016_vm3 = vcmp.lt.s32.totalorder %v2771_v54, 2 }
  0xf3   :  { %2013 = vcosq.f32 %v863_v61  ;;  %v947_v47 = vclz %v1880_v53  ;;  %v1020_v41 = vsel %vm1018_vm15, %v1008_v60, 2102212464  ;;  %v1023_v12 = vsel %vm1015_vm1, %v1002_v35, %v1005_v19 }
  0xf4   :  { %2015 = vsinq.f32 %v863_v61  ;;  %vm874_vm5 = vcmp.eq.s32.totalorder %v2767_v14, 2  ;;  %v1021_v37 = vsel %vm1017_vm2, %v1005_v19, %v1020_v41  ;;  %v1024_v11 = vsel %vm1018_vm15, %v1011_v34, 920167782 }
  0xf5   :  { %v1881_v4 = vadd.s32 4294967294, %v947_v47  ;;  %v1027_v50 = vsel %vm1015_vm1, %v1005_v19, %v1008_v60  ;;  %vm871_vm6 = vcmp.eq.s32.totalorder %v2767_v14, 0  ;;  %v965_v33 = vsub.s32 4, %v2769_v57 }
  0xf6   :  { %v1022_v51 = vsel %vm1016_vm3, %v1019_v2, %v1021_v37  ;;  %v1025_v38 = vsel %vm1017_vm2, %v1008_v60, %v1024_v11  ;;  %v1028_v22 = vsel %vm1018_vm15, %v1014_v52, 1326507024  ;;  %vm870_vm4 = vcmp.lt.s32.totalorder %v2767_v14, 2 }
  0xf7   :  { %vm1882_vm7 = vcmp.lt.s32.totalorder %v1881_v4, 0  ;;  %v1026_v58 = vsel %vm1016_vm3, %v1023_v12, %v1025_v38  ;;  %v1029_v15 = vsel %vm1017_vm2, %v1011_v34, %v1028_v22  ;;  %v2835_v42 = vshrl.u32 %v1099_v40, 5 }
  0xf8   :  { %vm867_vm8 = vweird.f32 %v2141_v23  ;;  %v950_v45 = vsel %vm1882_vm7, 0, %v1881_v4  ;;  %v1030_v48 = vsel %vm1016_vm3, %v1027_v50, %v1029_v15  ;;  %v1101_v36 = vand.u32 31, %v1099_v40 }
  0xf9   :  { %v2841_v43 = vmul.u32.u64.low %v2790_v56, %v1026_v58  ;;  %v2842_v21 = vmul.u32.u64.high %v2790_v56, %v1026_v58, %v2841_v43  ;;  %v951_v13 = vsub.s32 32, %v950_v45  ;;  %v952_v8 = vshll.u32 %v2784_v59, %v950_v45 }
  0xfa   :  { %v955_v44 = vsub.s32 4294967266, %v950_v45  ;;  %v2849_v46 = vsel %vm881_vm0, %v965_v33, %v2769_v57  ;;  %v2852_v18 = vmul.u32.u64.low %v2790_v56, %v1030_v48  ;;  %v2853_v62 = vmul.u32.u64.high %v2790_v56, %v1030_v48, %v2852_v18 }
  0xfb   :  { %v1038_v54 = vmul.u32 %v2790_v56, %v1022_v51  ;;  %v953_v35 = vshrl.u32 %v935_v55, %v951_v13  ;;  %v1102_v60 = vsub.s32 32, %v1101_v36  ;;  %vm1119_vm9 = vcmp.lt.s32.totalorder %v2835_v42, 1 }
  0xfc   :  { %v956_v19 = vadd.s32 127, %v955_v44  ;;  %v1041_v59 = vadd.s32 1, %v2842_v21  ;;  %v1104_v20 = vshll.u32 %v2102_v1, %v1101_v36  ;;  %v1107_v6 = vshll.u32 %v2103_v3, %v1101_v36 }
  0xfd   :  { %v1110_v57 = vshll.u32 %v2104_v5, %v1101_v36  ;;  %v2014_v16 = vpop.eup %2013  ;;  %vm2863_vm11 = vcmp.le.f32.partialorder %v879_v63, 0.7853982  ;;  %v954_v55 = vor.u32 %v953_v35, %v952_v8  ;;  %v1105_v34 = vshrl.u32 %v2103_v3, %v1102_v60 }
  0xfe   :  { %v957_v56 = vshll.u32 %v956_v19, 23  ;;  %v1113_v61 = vshll.u32 %v2105_v7, %v1101_v36  ;;  %v2016_v52 = vpop.eup %2015  ;;  %v875_v40 = vxor.u32 2147483648, %v2014_v16  ;;  %vm1040_vm10 = vc.u32 %v2853_v62, %v2841_v43 }
  0xff   :  { %v1103_v47 = vshrl.u32 %v2102_v1, %v1102_v60  ;;  %v1108_v2 = vshrl.u32 %v2104_v5, %v1102_v60  ;;  %v872_v41 = vxor.u32 2147483648, %v2016_v52  ;;  %v961_v12 = vcvt.s32.f32 %v954_v55 }
 0x100   :  { %v958_v63 = vor.u32 4788187, %v957_v56  ;;  %v1042_v4 = vsel %vm1040_vm10, %v1041_v59, %v2842_v21  ;;  %v876_v37 = vsel %vm874_vm5, %v875_v40, %v2016_v52  ;;  %v1106_v50 = vor.u32 %v1105_v34, %v1104_v20 }
 0x101   :  { %v1043_v11 = vadd.s32 %v1042_v4, %v1038_v54  ;;  %v1109_v33 = vor.u32 %v1108_v2, %v1107_v6  ;;  %v873_v51 = vsel %vm871_vm6, %v2014_v16, %v872_v41  ;;  %v1111_v22 = vshrl.u32 %v2105_v7, %v1102_v60 }
 0x102   :  { %v959_v38 = vand.u32 2147483647, %v958_v63  ;;  %v1114_v58 = vshrl.u32 %v2106_v9, %v1102_v60  ;;  %v877_v15 = vsel %vm870_vm4, %v873_v51, %v876_v37  ;;  %v1116_v48 = vshll.u32 %v2106_v9, %v1101_v36 }
 0x103   :  { %v1044_v45 = vadd.s32 536870912, %v1043_v11  ;;  %v1117_v21 = vshrl.u32 %v2107_v17, %v1102_v60  ;;  %v878_v13 = vsel %vm867_vm8, nan, %v877_v15  ;;  %v1112_v44 = vor.u32 %v1111_v22, %v1110_v57 }
 0x104   :  { %v962_v8 = vmul.f32 %v961_v12, %v959_v38  ;;  %v1115_v18 = vor.u32 %v1114_v58, %v1113_v61  ;;  %vm1120_vm12 = vcmp.lt.s32.totalorder %v2835_v42, 2  ;;  %vm1121_vm13 = vcmp.lt.s32.totalorder %v2835_v42, 3  ;;  %1821 = vst [vmem:[#allocation5 + $0x30] sm:$0xff] %v878_v13 }
 0x105   :  { %v1045_v54 = vshrl.u32 %v1044_v45, 30  ;;  %vm1122_vm14 = vcmp.lt.s32.totalorder %v2835_v42, 4  ;;  %v1118_v35 = vor.u32 %v1117_v21, %v1116_v48  ;;  %v1127_v23 = vsel %vm1119_vm9, %v1106_v50, %v1109_v33 }
 0x106   :  { %v963_v14 = vxor.u32 2147483648, %v962_v8  ;;  %v1124_v36 = vsel %vm1122_vm14, %v1112_v44, 2102212464  ;;  %v968_v19 = vsel %vm2863_vm11, 0, %v2849_v46  ;;  %v1128_v59 = vsel %vm1122_vm14, %v1115_v18, 920167782 }
 0x107   :  { %v1046_v60 = vshll.u32 %v1045_v54, 30  ;;  %v1135_v20 = vshll.u32 %v1095_v10, 8  ;;  %v1123_v57 = vsel %vm1119_vm9, %v1103_v47, %v1106_v50  ;;  %v1125_v16 = vsel %vm1121_vm13, %v1109_v33, %v1124_v36 }
 0x108   :  { %v964_v6 = vsel %vm881_vm0, %v963_v14, %v962_v8  ;;  %v1129_v55 = vsel %vm1121_vm13, %v1112_v44, %v1128_v59  ;;  %v1131_v10 = vsel %vm1119_vm9, %v1109_v33, %v1112_v44  ;;  %v972_v34 = vadd.s32 3, %v968_v19 }
 0x109   :  { %v967_v46 = vsel %vm2863_vm11, %v2143_v24, %v964_v6  ;;  %v1047_v56 = vsub.s32 %v1043_v11, %v1046_v60  ;;  %v1130_v39 = vsel %vm1120_vm12, %v1127_v23, %v1129_v55  ;;  %v1069_v61 = vsub.s32 4, %v1045_v54 }
 0x10a   :  { %2017 = vcosq.f32 %v967_v46  ;;  %v1132_v52 = vsel %vm1122_vm14, %v1118_v35, 1326507024  ;;  %v1126_v53 = vsel %vm1120_vm12, %v1123_v57, %v1125_v16  ;;  %vm985_vm0 = vcmp.lt.s32.totalorder %v2145_v25, 0 }
 0x10b   :  { %2019 = vsinq.f32 %v967_v46  ;;  %v1049_v40 = vsub.s32 0, %v1047_v56  ;;  %v1133_v47 = vsel %vm1121_vm13, %v1115_v18, %v1132_v52  ;;  %v973_v11 = vand.u32 3, %v972_v34 }
 0x10c   :  { %v1134_v2 = vsel %vm1120_vm12, %v1131_v10, %v1133_v47  ;;  %v2923_v41 = vmul.u32.u64.low %v1135_v20, %v1130_v39  ;;  %v2924_v63 = vmul.u32.u64.high %v1135_v20, %v1130_v39, %v2923_v41  ;;  %v1070_v50 = vsel %vm985_vm0, %v1069_v61, %v1045_v54 }
 0x10d   :  { %v1884_v12 = vmin.u32 %v1049_v40, %v1047_v56  ;;  %v2927_v4 = vmul.u32.u64.low %v1135_v20, %v1134_v2  ;;  %v2928_v37 = vmul.u32.u64.high %v1135_v20, %v1134_v2, %v2927_v4  ;;  %v1194_v33 = vand.u32 2139095040, %v2149_v27 }
 0x10e   :  { %v1142_v38 = vmul.u32 %v1135_v20, %v1126_v53  ;;  %vm2935_vm1 = vcmp.le.f32.partialorder %v983_v49, 0.7853982  ;;  %v1145_v22 = vadd.s32 1, %v2924_v63  ;;  %vm971_vm15 = vweird.f32 %v2143_v24 }
 0x10f   :  { %v1051_v51 = vclz %v1884_v12  ;;  %v1195_v58 = vshrl.u32 %v1194_v33, 23  ;;  %v1072_v45 = vsel %vm2935_vm1, 0, %v1070_v50  ;;  %vm1144_vm2 = vc.u32 %v2928_v37, %v2923_v41 }
 0x110   :  { %vm974_vm3 = vcmp.lt.s32.totalorder %v973_v11, 2  ;;  %v1146_v48 = vsel %vm1144_vm2, %v1145_v22, %v2924_v63  ;;  %v1191_v21 = vand.u32 2147483647, %v2149_v27  ;;  %vm975_vm5 = vcmp.eq.s32.totalorder %v973_v11, 0 }
 0x111   :  { %v1885_v15 = vadd.s32 4294967294, %v1051_v51  ;;  %v1891_v49 = vadd.s32 4294967169, %v1195_v58  ;;  %v1039_v13 = vadd.s32 %v2841_v43, %v2853_v62  ;;  %v1147_v8 = vadd.s32 %v1146_v48, %v1142_v38 }
 0x112   :  { %vm978_vm4 = vcmp.eq.s32.totalorder %v973_v11, 2  ;;  %v1076_v54 = vadd.s32 3, %v1072_v45  ;;  %v1198_v6 = vand.u32 8388607, %v1191_v21  ;;  %v1298_v10 = vand.u32 2139095040, %v2151_v28 }
 0x113   :  { %vm1886_vm6 = vcmp.lt.s32.totalorder %v1885_v15, 0  ;;  %v1201_v14 = vadd.s32 1, %v1891_v49  ;;  %v1148_v20 = vadd.s32 536870912, %v1147_v8  ;;  %v1143_v12 = vadd.s32 %v2923_v41, %v2928_v37 }
 0x114   :  { %v2018_v44 = vpop.eup %2017  ;;  %v1054_v18 = vsel %vm1886_vm6, 0, %v1885_v15  ;;  %v2957_v40 = vand.u32 3, %v1076_v54  ;;  %v1199_v4 = vor.u32 8388608, %v1198_v6  ;;  %v1299_v51 = vshrl.u32 %v1298_v10, 23 }
 0x115   :  { %v2020_v35 = vpop.eup %2019  ;;  %v979_v36 = vxor.u32 2147483648, %v2018_v44  ;;  %v1055_v23 = vsub.s32 32, %v1054_v18  ;;  %v1056_v19 = vshll.u32 %v1047_v56, %v1054_v18  ;;  %v1059_v60 = vsub.s32 4294967266, %v1054_v18 }
 0x116   :  { %v976_v59 = vxor.u32 2147483648, %v2020_v35  ;;  %vm1202_vm7 = vcmp.gt.s32.totalorder %v1201_v14, 0  ;;  %v2951_v46 = vshrl.u32 %v1148_v20, 30  ;;  %v1295_v58 = vand.u32 2147483647, %v2151_v28 }
 0x117   :  { %v980_v57 = vsel %vm978_vm4, %v979_v36, %v2020_v35  ;;  %v1057_v43 = vshrl.u32 %v1039_v13, %v1055_v23  ;;  %v1060_v62 = vadd.s32 127, %v1059_v60  ;;  %v1203_v16 = vsel %vm1202_vm7, %v1201_v14, 0 }
 0x118   :  { %v977_v55 = vsel %vm975_vm5, %v2018_v44, %v976_v59  ;;  %v1205_v39 = vand.u32 31, %v1203_v16  ;;  %v1150_v47 = vshll.u32 %v2951_v46, 30  ;;  %v1204_v45 = vshrl.u32 %v1203_v16, 5 }
 0x119   :  { %v981_v56 = vsel %vm974_vm3, %v977_v55, %v980_v57  ;;  %v1058_v34 = vor.u32 %v1057_v43, %v1056_v19  ;;  %v1061_v61 = vshll.u32 %v1060_v62, 23  ;;  %vm1089_vm8 = vcmp.lt.s32.totalorder %v2147_v26, 0 }
 0x11a   :  { %v982_v52 = vsel %vm971_vm15, nan, %v981_v56  ;;  %v1206_v53 = vsub.s32 32, %v1205_v39  ;;  %v2961_v50 = vsub.s32 %v1147_v8, %v1150_v47  ;;  %v1208_v11 = vshll.u32 %v2102_v1, %v1205_v39 }
 0x11b   :  { %v1062_v2 = vor.u32 4788187, %v1061_v61  ;;  %v1065_v63 = vcvt.s32.f32 %v1058_v34  ;;  %1822 = vst [vmem:[#allocation5 + $0x38] sm:$0xff] %v982_v52  ;;  %v1211_v38 = vshll.u32 %v2103_v3, %v1205_v39  ;;  %v1214_v41 = vshll.u32 %v2104_v5, %v1205_v39 }
 0x11c   :  { %v1209_v33 = vshrl.u32 %v2103_v3, %v1206_v53  ;;  %v1212_v22 = vshrl.u32 %v2104_v5, %v1206_v53  ;;  %v1153_v15 = vsub.s32 0, %v2961_v50  ;;  %v1215_v37 = vshrl.u32 %v2105_v7, %v1206_v53 }
 0x11d   :  { %v1063_v24 = vand.u32 2147483647, %v1062_v2  ;;  %v1217_v49 = vshll.u32 %v2105_v7, %v1205_v39  ;;  %v1218_v13 = vshrl.u32 %v2106_v9, %v1206_v53  ;;  %v2973_v8 = vshll.u32 %v1199_v4, 8 }
 0x11e   :  { %v1888_v44 = vmin.u32 %v1153_v15, %v2961_v50  ;;  %v1210_v18 = vor.u32 %v1209_v33, %v1208_v11  ;;  %v1220_v54 = vshll.u32 %v2106_v9, %v1205_v39  ;;  %v1895_v14 = vadd.s32 4294967169, %v1299_v51 }
 0x11f   :  { %v1066_v48 = vmul.f32 %v1065_v63, %v1063_v24  ;;  %v1213_v36 = vor.u32 %v1212_v22, %v1211_v38  ;;  %v1219_v23 = vor.u32 %v1218_v13, %v1217_v49  ;;  %v1221_v19 = vshrl.u32 %v2107_v17, %v1206_v53 }
 0x120   :  { %v1155_v60 = vclz %v1888_v44  ;;  %v1207_v59 = vshrl.u32 %v2102_v1, %v1206_v53  ;;  %v1216_v20 = vor.u32 %v1215_v37, %v1214_v41  ;;  %vm1223_vm9 = vcmp.lt.s32.totalorder %v1204_v45, 1 }
 0x121   :  { %v1067_v35 = vxor.u32 2147483648, %v1066_v48  ;;  %v1173_v57 = vsub.s32 4, %v2951_v46  ;;  %v1222_v43 = vor.u32 %v1221_v19, %v1220_v54  ;;  %vm1225_vm11 = vcmp.lt.s32.totalorder %v1204_v45, 3 }
 0x122   :  { %v1889_v16 = vadd.s32 4294967294, %v1155_v60  ;;  %vm1224_vm10 = vcmp.lt.s32.totalorder %v1204_v45, 2  ;;  %vm1226_vm12 = vcmp.lt.s32.totalorder %v1204_v45, 4  ;;  %v1231_v39 = vsel %vm1223_vm9, %v1210_v18, %v1213_v36 }
 0x123   :  { %v1068_v6 = vsel %vm985_vm0, %v1067_v35, %v1066_v48  ;;  %v1228_v55 = vsel %vm1226_vm12, %v1216_v20, 2102212464  ;;  %v1232_v10 = vsel %vm1226_vm12, %v1219_v23, 920167782  ;;  %v1227_v56 = vsel %vm1223_vm9, %v1207_v59, %v1210_v18 }
 0x124   :  { %v1071_v62 = vsel %vm2935_vm1, %v2145_v25, %v1068_v6  ;;  %vm1890_vm13 = vcmp.lt.s32.totalorder %v1889_v16, 0  ;;  %v1233_v34 = vsel %vm1225_vm11, %v1216_v20, %v1232_v10  ;;  %v1229_v42 = vsel %vm1225_vm11, %v1213_v36, %v1228_v55 }
 0x125   :  { %2021 = vcosq.f32 %v1071_v62  ;;  %v1158_v61 = vsel %vm1890_vm13, 0, %v1889_v16  ;;  %v1234_v52 = vsel %vm1224_vm10, %v1231_v39, %v1233_v34  ;;  %v1235_v47 = vsel %vm1223_vm9, %v1213_v36, %v1216_v20 }
 0x126   :  { %2023 = vsinq.f32 %v1071_v62  ;;  %v1159_v53 = vsub.s32 32, %v1158_v61  ;;  %v1160_v2 = vshll.u32 %v2961_v50, %v1158_v61  ;;  %v1163_v63 = vsub.s32 4294967266, %v1158_v61 }
 0x127   :  { %v1236_v4 = vsel %vm1226_vm12, %v1222_v43, 1326507024  ;;  %v1174_v11 = vsel %vm1089_vm8, %v1173_v57, %v2951_v46  ;;  %v3001_v51 = vmul.u32.u64.low %v2973_v8, %v1234_v52  ;;  %v3002_v24 = vmul.u32.u64.high %v2973_v8, %v1234_v52, %v3001_v51 }
 0x128   :  { %v1237_v33 = vsel %vm1225_vm11, %v1219_v23, %v1236_v4  ;;  %v1161_v38 = vshrl.u32 %v1143_v12, %v1159_v53  ;;  %v1164_v22 = vadd.s32 127, %v1163_v63  ;;  %v1230_v15 = vsel %vm1224_vm10, %v1227_v56, %v1229_v42 }
 0x129   :  { %v1238_v50 = vsel %vm1224_vm10, %v1235_v47, %v1237_v33  ;;  %vm1075_vm14 = vweird.f32 %v2145_v25  ;;  %v1305_v46 = vadd.s32 1, %v1895_v14  ;;  %vm3014_vm0 = vcmp.le.f32.partialorder %v1087_v0, 0.7853982 }
 0x12a   :  { %v3009_v41 = vmul.u32.u64.low %v2973_v8, %v1238_v50  ;;  %v3010_v37 = vmul.u32.u64.high %v2973_v8, %v1238_v50, %v3009_v41  ;;  %v1162_v49 = vor.u32 %v1161_v38, %v1160_v2  ;;  %v1165_v12 = vshll.u32 %v1164_v22, 23 }
 0x12b   :  { %v3020_v13 = vand.u32 8388607, %v1295_v58  ;;  %v1176_v45 = vsel %vm3014_vm0, 0, %v1174_v11  ;;  %v1246_v44 = vmul.u32 %v2973_v8, %v1230_v15  ;;  %v1249_v18 = vadd.s32 1, %v3002_v24 }
 0x12c   :  { %vm1306_vm1 = vcmp.gt.s32.totalorder %v1305_v46, 0  ;;  %vm1078_vm15 = vcmp.lt.s32.totalorder %v2957_v40, 2  ;;  %v1166_v0 = vor.u32 4788187, %v1165_v12  ;;  %v1169_v54 = vcvt.s32.f32 %v1162_v49 }
 0x12d   :  { %v1307_v14 = vsel %vm1306_vm1, %v1305_v46, 0  ;;  %vm1079_vm2 = vcmp.eq.s32.totalorder %v2957_v40, 0  ;;  %vm1082_vm3 = vcmp.eq.s32.totalorder %v2957_v40, 2  ;;  %vm1248_vm5 = vc.u32 %v3010_v37, %v3001_v51 }
 0x12e   :  { %v1309_v36 = vand.u32 31, %v1307_v14  ;;  %v1167_v8 = vand.u32 2147483647, %v1166_v0  ;;  %v1180_v60 = vadd.s32 3, %v1176_v45  ;;  %v1250_v59 = vsel %vm1248_vm5, %v1249_v18, %v3002_v24 }
 0x12f   :  { %v2022_v35 = vpop.eup %2021  ;;  %v1251_v6 = vadd.s32 %v1250_v59, %v1246_v44  ;;  %v1303_v57 = vor.u32 8388608, %v3020_v13  ;;  %v3033_v55 = vshrl.u32 %v1307_v14, 5  ;;  %v1402_v38 = vand.u32 2139095040, %v2153_v29 }
 0x130   :  { %v2024_v23 = vpop.eup %2023  ;;  %v1083_v19 = vxor.u32 2147483648, %v2022_v35  ;;  %v1310_v43 = vsub.s32 32, %v1309_v36  ;;  %v1170_v16 = vmul.f32 %v1169_v54, %v1167_v8  ;;  %v1312_v39 = vshll.u32 %v2102_v1, %v1309_v36 }
 0x131   :  { %v1080_v20 = vxor.u32 2147483648, %v2024_v23  ;;  %v1252_v56 = vadd.s32 536870912, %v1251_v6  ;;  %v1315_v61 = vshll.u32 %v2103_v3, %v1309_v36  ;;  %v1318_v53 = vshll.u32 %v2104_v5, %v1309_v36 }
 0x132   :  { %v1084_v62 = vsel %vm1082_vm3, %v1083_v19, %v2024_v23  ;;  %v1313_v34 = vshrl.u32 %v2103_v3, %v1310_v43  ;;  %v1171_v52 = vxor.u32 2147483648, %v1170_v16  ;;  %v1316_v47 = vshrl.u32 %v2104_v5, %v1310_v43 }
 0x133   :  { %v1081_v10 = vsel %vm1079_vm2, %v2022_v35, %v1080_v20  ;;  %v3046_v63 = vshrl.u32 %v1252_v56, 30  ;;  %v1319_v4 = vshrl.u32 %v2105_v7, %v1310_v43  ;;  %v1321_v11 = vshll.u32 %v2105_v7, %v1309_v36 }
 0x134   :  { %v1085_v42 = vsel %vm1078_vm15, %v1081_v10, %v1084_v62  ;;  %v1172_v33 = vsel %vm1089_vm8, %v1171_v52, %v1170_v16  ;;  %v1311_v40 = vshrl.u32 %v2102_v1, %v1310_v43  ;;  %v1322_v24 = vshrl.u32 %v2106_v9, %v1310_v43 }
 0x135   :  { %v1086_v2 = vsel %vm1075_vm14, nan, %v1085_v42  ;;  %v1175_v25 = vsel %vm3014_vm0, %v2147_v26, %v1172_v33  ;;  %v1254_v22 = vshll.u32 %v3046_v63, 30  ;;  %v1314_v15 = vor.u32 %v1313_v34, %v1312_v39 }
 0x136   :  { %1823 = vst [vmem:[#allocation5 + $0x40] sm:$0xff] %v1086_v2  ;;  %v1324_v50 = vshll.u32 %v2106_v9, %v1309_v36  ;;  %2025 = vcosq.f32 %v1175_v25  ;;  %v1317_v41 = vor.u32 %v1316_v47, %v1315_v61  ;;  %v1323_v46 = vor.u32 %v1322_v24, %v1321_v11 }
 0x137   :  { %v1325_v49 = vshrl.u32 %v2107_v17, %v1310_v43  ;;  %2027 = vsinq.f32 %v1175_v25  ;;  %v3061_v12 = vsub.s32 %v1251_v6, %v1254_v22  ;;  %v1320_v13 = vor.u32 %v1319_v4, %v1318_v53 }
 0x138   :  { %vm1327_vm6 = vcmp.lt.s32.totalorder %v3033_v55, 1  ;;  %vm1329_vm4 = vcmp.lt.s32.totalorder %v3033_v55, 3  ;;  %vm1330_vm7 = vcmp.lt.s32.totalorder %v3033_v55, 4  ;;  %v1403_v48 = vshrl.u32 %v1402_v38, 23 }
 0x139   :  { %v1326_v45 = vor.u32 %v1325_v49, %v1324_v50  ;;  %v1181_v44 = vand.u32 3, %v1180_v60  ;;  %v1257_v18 = vsub.s32 0, %v3061_v12  ;;  %vm1328_vm8 = vcmp.lt.s32.totalorder %v3033_v55, 2 }
 0x13a   :  { %v1332_v0 = vsel %vm1330_vm7, %v1320_v13, 2102212464  ;;  %v1335_v54 = vsel %vm1327_vm6, %v1314_v15, %v1317_v41  ;;  %v1336_v14 = vsel %vm1330_vm7, %v1323_v46, 920167782  ;;  %v1343_v35 = vshll.u32 %v1303_v57, 8 }
 0x13b   :  { %v1399_v36 = vand.u32 2147483647, %v2153_v29  ;;  %vm1179_vm9 = vweird.f32 %v2147_v26  ;;  %vm1193_vm11 = vcmp.lt.s32.totalorder %v2149_v27, 0  ;;  %v1892_v23 = vmin.u32 %v1257_v18, %v3061_v12 }
 0x13c   :  { %v1331_v19 = vsel %vm1327_vm6, %v1311_v40, %v1314_v15  ;;  %v1333_v8 = vsel %vm1329_vm4, %v1317_v41, %v1332_v0  ;;  %v1337_v60 = vsel %vm1329_vm4, %v1320_v13, %v1336_v14  ;;  %v1339_v20 = vsel %vm1327_vm6, %v1317_v41, %v1320_v13 }
 0x13d   :  { %v1338_v59 = vsel %vm1328_vm8, %v1335_v54, %v1337_v60  ;;  %v1340_v6 = vsel %vm1330_vm7, %v1326_v45, 1326507024  ;;  %v1899_v57 = vadd.s32 4294967169, %v1403_v48  ;;  %vm1182_vm10 = vcmp.lt.s32.totalorder %v1181_v44, 2 }
 0x13e   :  { %vm1183_vm12 = vcmp.eq.s32.totalorder %v1181_v44, 0  ;;  %vm1186_vm13 = vcmp.eq.s32.totalorder %v1181_v44, 2  ;;  %v1259_v43 = vclz %v1892_v23  ;;  %v1334_v62 = vsel %vm1328_vm8, %v1331_v19, %v1333_v8 }
 0x13f   :  { %v1341_v16 = vsel %vm1329_vm4, %v1323_v46, %v1340_v6  ;;  %v3094_v39 = vmul.u32.u64.low %v1343_v35, %v1338_v59  ;;  %v3095_v10 = vmul.u32.u64.high %v1343_v35, %v1338_v59, %v3094_v39  ;;  %v3102_v61 = vand.u32 8388607, %v1399_v36 }
 0x140   :  { %v1893_v56 = vadd.s32 4294967294, %v1259_v43  ;;  %v1342_v34 = vsel %vm1328_vm8, %v1339_v20, %v1341_v16  ;;  %v1409_v42 = vadd.s32 1, %v1899_v57  ;;  %v2026_v52 = vpop.eup %2025  ;;  %v1247_v47 = vadd.s32 %v3001_v51, %v3010_v37 }
 0x141   :  { %v1277_v53 = vsub.s32 4, %v3046_v63  ;;  %v3107_v2 = vmul.u32.u64.low %v1343_v35, %v1342_v34  ;;  %v3108_v4 = vmul.u32.u64.high %v1343_v35, %v1342_v34, %v3107_v2  ;;  %v2028_v11 = vpop.eup %2027  ;;  %v1187_v33 = vxor.u32 2147483648, %v2026_v52 }
 0x142   :  { %vm1894_vm14 = vcmp.lt.s32.totalorder %v1893_v56, 0  ;;  %v1350_v40 = vmul.u32 %v1343_v35, %v1334_v62  ;;  %vm1410_vm0 = vcmp.gt.s32.totalorder %v1409_v42, 0  ;;  %v1184_v55 = vxor.u32 2147483648, %v2028_v11 }
 0x143   :  { %v1262_v24 = vsel %vm1894_vm14, 0, %v1893_v56  ;;  %v1353_v38 = vadd.s32 1, %v3095_v10  ;;  %v1411_v25 = vsel %vm1410_vm0, %v1409_v42, 0  ;;  %v1188_v22 = vsel %vm1186_vm13, %v1187_v33, %v2028_v11 }
 0x144   :  { %v1263_v15 = vsub.s32 32, %v1262_v24  ;;  %v1264_v51 = vshll.u32 %v3061_v12, %v1262_v24  ;;  %v1267_v37 = vsub.s32 4294967266, %v1262_v24  ;;  %v1185_v50 = vsel %vm1183_vm12, %v2026_v52, %v1184_v55 }
 0x145   :  { %vm3116_vm1 = vcmp.le.f32.partialorder %v1191_v21, 0.7853982  ;;  %v1278_v46 = vsel %vm1193_vm11, %v1277_v53, %v3046_v63  ;;  %vm1352_vm15 = vc.u32 %v3108_v4, %v3094_v39  ;;  %v1189_v49 = vsel %vm1182_vm10, %v1185_v50, %v1188_v22 }
 0x146   :  { %v1265_v13 = vshrl.u32 %v1247_v47, %v1263_v15  ;;  %v1268_v12 = vadd.s32 127, %v1267_v37  ;;  %v1354_v45 = vsel %vm1352_vm15, %v1353_v38, %v3095_v10  ;;  %v1190_v48 = vsel %vm1179_vm9, nan, %v1189_v49 }
 0x147   :  { %v1355_v21 = vadd.s32 %v1354_v45, %v1350_v40  ;;  %v3129_v18 = vshrl.u32 %v1411_v25, 5  ;;  %v1413_v0 = vand.u32 31, %v1411_v25  ;;  %v1280_v63 = vsel %vm3116_vm1, 0, %v1278_v46  ;;  %1824 = vst [vmem:[#allocation5 + $0x48] sm:$0xff] %v1190_v48 }
 0x148   :  { %v1266_v54 = vor.u32 %v1265_v13, %v1264_v51  ;;  %v1269_v14 = vshll.u32 %v1268_v12, 23  ;;  %v1407_v35 = vor.u32 8388608, %v3102_v61  ;;  %v1284_v33 = vadd.s32 3, %v1280_v63 }
 0x149   :  { %v1356_v44 = vadd.s32 536870912, %v1355_v21  ;;  %v1414_v23 = vsub.s32 32, %v1413_v0  ;;  %v1416_v19 = vshll.u32 %v2102_v1, %v1413_v0  ;;  %v1419_v8 = vshll.u32 %v2103_v3, %v1413_v0 }
 0x14a   :  { %v1270_v26 = vor.u32 4788187, %v1269_v14  ;;  %v1273_v60 = vcvt.s32.f32 %v1266_v54  ;;  %v1422_v59 = vshll.u32 %v2104_v5, %v1413_v0  ;;  %v1425_v20 = vshll.u32 %v2105_v7, %v1413_v0 }
 0x14b   :  { %v1357_v6 = vshrl.u32 %v1356_v44, 30  ;;  %v1417_v57 = vshrl.u32 %v2103_v3, %v1414_v23  ;;  %v1420_v43 = vshrl.u32 %v2104_v5, %v1414_v23  ;;  %vm1431_vm2 = vcmp.lt.s32.totalorder %v3129_v18, 1 }
 0x14c   :  { %v1271_v62 = vand.u32 2147483647, %v1270_v26  ;;  %v1423_v16 = vshrl.u32 %v2105_v7, %v1414_v23  ;;  %v1426_v10 = vshrl.u32 %v2106_v9, %v1414_v23  ;;  %v1428_v56 = vshll.u32 %v2106_v9, %v1413_v0 }
 0x14d   :  { %v1358_v34 = vshll.u32 %v1357_v6, 30  ;;  %v1415_v61 = vshrl.u32 %v2102_v1, %v1414_v23  ;;  %v1418_v42 = vor.u32 %v1417_v57, %v1416_v19  ;;  %v1421_v52 = vor.u32 %v1420_v43, %v1419_v8 }
 0x14e   :  { %v1274_v47 = vmul.f32 %v1273_v60, %v1271_v62  ;;  %v1424_v53 = vor.u32 %v1423_v16, %v1422_v59  ;;  %v1427_v2 = vor.u32 %v1426_v10, %v1425_v20  ;;  %v1429_v11 = vshrl.u32 %v2107_v17, %v1414_v23 }
 0x14f   :  { %v3146_v40 = vsub.s32 %v1355_v21, %v1358_v34  ;;  %vm1434_vm3 = vcmp.lt.s32.totalorder %v3129_v18, 4  ;;  %vm1433_vm5 = vcmp.lt.s32.totalorder %v3129_v18, 3  ;;  %vm1432_vm6 = vcmp.lt.s32.totalorder %v3129_v18, 2 }
 0x150   :  { %v1275_v55 = vxor.u32 2147483648, %v1274_v47  ;;  %v1430_v24 = vor.u32 %v1429_v11, %v1428_v56  ;;  %v1436_v38 = vsel %vm1434_vm3, %v1424_v53, 2102212464  ;;  %v1439_v22 = vsel %vm1431_vm2, %v1418_v42, %v1421_v52 }
 0x151   :  { %v1361_v25 = vsub.s32 0, %v3146_v40  ;;  %v1447_v15 = vshll.u32 %v1407_v35, 8  ;;  %v1381_v37 = vsub.s32 4, %v1357_v6  ;;  %v1435_v50 = vsel %vm1431_vm2, %v1415_v61, %v1418_v42 }
 0x152   :  { %v1276_v51 = vsel %vm1193_vm11, %v1275_v55, %v1274_v47  ;;  %v1440_v46 = vsel %vm1434_vm3, %v1427_v2, 920167782  ;;  %v1437_v12 = vsel %vm1433_vm5, %v1421_v52, %v1436_v38  ;;  %v1443_v21 = vsel %vm1431_vm2, %v1421_v52, %v1424_v53 }
 0x153   :  { %v1279_v49 = vsel %vm3116_vm1, %v2149_v27, %v1276_v51  ;;  %v1896_v13 = vmin.u32 %v1361_v25, %v3146_v40  ;;  %v1441_v45 = vsel %vm1433_vm5, %v1424_v53, %v1440_v46  ;;  %v1444_v0 = vsel %vm1434_vm3, %v1430_v24, 1326507024 }
 0x154   :  { %2029 = vcosq.f32 %v1279_v49  ;;  %v1442_v48 = vsel %vm1432_vm6, %v1439_v22, %v1441_v45  ;;  %vm1297_vm4 = vcmp.lt.s32.totalorder %v2151_v28, 0  ;;  %v1445_v14 = vsel %vm1433_vm5, %v1427_v2, %v1444_v0 }
 0x155   :  { %2031 = vsinq.f32 %v1279_v49  ;;  %v1363_v41 = vclz %v1896_v13  ;;  %v1382_v54 = vsel %vm1297_vm4, %v1381_v37, %v1357_v6  ;;  %v1438_v23 = vsel %vm1432_vm6, %v1435_v50, %v1437_v12 }
 0x156   :  { %v3181_v63 = vmul.u32.u64.low %v1447_v15, %v1442_v48  ;;  %v3182_v35 = vmul.u32.u64.high %v1447_v15, %v1442_v48, %v3181_v63  ;;  %v1446_v19 = vsel %vm1432_vm6, %v1443_v21, %v1445_v14  ;;  %v1506_v8 = vand.u32 2139095040, %v2155_v30 }
 0x157   :  { %v1897_v44 = vadd.s32 4294967294, %v1363_v41  ;;  %v1285_v26 = vand.u32 3, %v1284_v33  ;;  %vm3191_vm7 = vcmp.le.f32.partialorder %v1295_v58, 0.7853982  ;;  %v1351_v6 = vadd.s32 %v3094_v39, %v3108_v4 }
 0x158   :  { %v3195_v59 = vmul.u32.u64.low %v1447_v15, %v1446_v19  ;;  %v3196_v20 = vmul.u32.u64.high %v1447_v15, %v1446_v19, %v3195_v59  ;;  %v1503_v57 = vand.u32 2147483647, %v2155_v30  ;;  %v1507_v18 = vshrl.u32 %v1506_v8, 23 }
 0x159   :  { %vm1898_vm8 = vcmp.lt.s32.totalorder %v1897_v44, 0  ;;  %v1384_v62 = vsel %vm3191_vm7, 0, %v1382_v54  ;;  %v1454_v16 = vmul.u32 %v1447_v15, %v1438_v23  ;;  %v1457_v58 = vadd.s32 1, %v3182_v35 }
 0x15a   :  { %v1366_v43 = vsel %vm1898_vm8, 0, %v1897_v44  ;;  %v1903_v61 = vadd.s32 4294967169, %v1507_v18  ;;  %vm1287_vm9 = vcmp.eq.s32.totalorder %v1285_v26, 0  ;;  %vm1456_vm11 = vc.u32 %v3196_v20, %v3181_v63 }
 0x15b   :  { %v1367_v10 = vsub.s32 32, %v1366_v43  ;;  %v1368_v56 = vshll.u32 %v3146_v40, %v1366_v43  ;;  %v1371_v34 = vsub.s32 4294967266, %v1366_v43  ;;  %v1458_v42 = vsel %vm1456_vm11, %v1457_v58, %v3182_v35 }
 0x15c   :  { %v1513_v52 = vadd.s32 1, %v1903_v61  ;;  %vm1290_vm10 = vcmp.eq.s32.totalorder %v1285_v26, 2  ;;  %v1388_v53 = vadd.s32 3, %v1384_v62  ;;  %v1459_v2 = vadd.s32 %v1458_v42, %v1454_v16 }
 0x15d   :  { %v1369_v39 = vshrl.u32 %v1351_v6, %v1367_v10  ;;  %v1372_v4 = vadd.s32 127, %v1371_v34  ;;  %v1510_v11 = vand.u32 8388607, %v1503_v57  ;;  %vm1286_vm13 = vcmp.lt.s32.totalorder %v1285_v26, 2 }
 0x15e   :  { %v2030_v47 = vpop.eup %2029  ;;  %vm1514_vm12 = vcmp.gt.s32.totalorder %v1513_v52, 0  ;;  %v1460_v25 = vadd.s32 536870912, %v1459_v2  ;;  %vm1283_vm14 = vweird.f32 %v2149_v27  ;;  %v3213_v48 = vand.u32 3, %v1388_v53 }
 0x15f   :  { %v2032_v33 = vpop.eup %2031  ;;  %v1291_v55 = vxor.u32 2147483648, %v2030_v47  ;;  %v1370_v40 = vor.u32 %v1369_v39, %v1368_v56  ;;  %v1373_v24 = vshll.u32 %v1372_v4, 23  ;;  %v1515_v22 = vsel %vm1514_vm12, %v1513_v52, 0 }
 0x160   :  { %v1288_v38 = vxor.u32 2147483648, %v2032_v33  ;;  %v3211_v46 = vshrl.u32 %v1460_v25, 30  ;;  %v1511_v49 = vor.u32 8388608, %v1510_v11  ;;  %v1517_v13 = vand.u32 31, %v1515_v22 }
 0x161   :  { %v1292_v15 = vsel %vm1290_vm10, %v1291_v55, %v2032_v33  ;;  %v1374_v51 = vor.u32 4788187, %v1373_v24  ;;  %v1377_v37 = vcvt.s32.f32 %v1370_v40  ;;  %v1610_v21 = vand.u32 2139095040, %v2157_v31 }
 0x162   :  { %v1289_v50 = vsel %vm1287_vm9, %v2030_v47, %v1288_v38  ;;  %v1462_v41 = vshll.u32 %v3211_v46, 30  ;;  %v1516_v54 = vshrl.u32 %v1515_v22, 5  ;;  %v1518_v27 = vsub.s32 32, %v1517_v13 }
 0x163   :  { %v1293_v12 = vsel %vm1286_vm13, %v1289_v50, %v1292_v15  ;;  %v1375_v45 = vand.u32 2147483647, %v1374_v51  ;;  %v1455_v35 = vadd.s32 %v3181_v63, %v3196_v20  ;;  %v1520_v44 = vshll.u32 %v2102_v1, %v1517_v13 }
 0x164   :  { %v1294_v0 = vsel %vm1283_vm14, nan, %v1293_v12  ;;  %v1607_v23 = vand.u32 2147483647, %v2157_v31  ;;  %v3220_v19 = vsub.s32 %v1459_v2, %v1462_v41  ;;  %v1521_v8 = vshrl.u32 %v2103_v3, %v1518_v27 }
 0x165   :  { %v1378_v14 = vmul.f32 %v1377_v37, %v1375_v45  ;;  %1825 = vst [vmem:[#allocation5 + $0x50] sm:$0xff] %v1294_v0  ;;  %v1523_v26 = vshll.u32 %v2103_v3, %v1517_v13  ;;  %v3224_v59 = vshll.u32 %v1511_v49, 8  ;;  %v1524_v18 = vshrl.u32 %v2104_v5, %v1518_v27 }
 0x166   :  { %v1526_v43 = vshll.u32 %v2104_v5, %v1517_v13  ;;  %v1527_v63 = vshrl.u32 %v2105_v7, %v1518_v27  ;;  %v1465_v20 = vsub.s32 0, %v3220_v19  ;;  %v1529_v62 = vshll.u32 %v2105_v7, %v1517_v13 }
 0x167   :  { %v1379_v6 = vxor.u32 2147483648, %v1378_v14  ;;  %vm1535_vm0 = vcmp.lt.s32.totalorder %v1516_v54, 1  ;;  %v1611_v16 = vshrl.u32 %v1610_v21, 23  ;;  %v1519_v10 = vshrl.u32 %v2102_v1, %v1518_v27 }
 0x168   :  { %v1522_v56 = vor.u32 %v1521_v8, %v1520_v44  ;;  %v1530_v34 = vshrl.u32 %v2106_v9, %v1518_v27  ;;  %v1900_v39 = vmin.u32 %v1465_v20, %v3220_v19  ;;  %v1525_v4 = vor.u32 %v1524_v18, %v1523_v26 }
 0x169   :  { %v1380_v58 = vsel %vm1297_vm4, %v1379_v6, %v1378_v14  ;;  %v1532_v42 = vshll.u32 %v2106_v9, %v1517_v13  ;;  %v1528_v52 = vor.u32 %v1527_v63, %v1526_v43  ;;  %v1533_v53 = vshrl.u32 %v2107_v17, %v1518_v27 }
 0x16a   :  { %v1383_v61 = vsel %vm3191_vm7, %v2151_v28, %v1380_v58  ;;  %v1531_v47 = vor.u32 %v1530_v34, %v1529_v62  ;;  %vm1401_vm1 = vcmp.lt.s32.totalorder %v2153_v29, 0  ;;  %v1467_v2 = vclz %v1900_v39 }
 0x16b   :  { %2033 = vcosq.f32 %v1383_v61  ;;  %vm1537_vm15 = vcmp.lt.s32.totalorder %v1516_v54, 3  ;;  %v1907_v11 = vadd.s32 4294967169, %v1611_v16  ;;  %v1534_v33 = vor.u32 %v1533_v53, %v1532_v42 }
 0x16c   :  { %2035 = vsinq.f32 %v1383_v61  ;;  %vm1536_vm2 = vcmp.lt.s32.totalorder %v1516_v54, 2  ;;  %vm1538_vm3 = vcmp.lt.s32.totalorder %v1516_v54, 4  ;;  %v1539_v60 = vsel %vm1535_vm0, %v1519_v10, %v1522_v56 }
 0x16d   :  { %v1901_v55 = vadd.s32 4294967294, %v1467_v2  ;;  %v1540_v40 = vsel %vm1538_vm3, %v1528_v52, 2102212464  ;;  %v1543_v24 = vsel %vm1535_vm0, %v1522_v56, %v1525_v4  ;;  %v1544_v38 = vsel %vm1538_vm3, %v1531_v47, 920167782 }
 0x16e   :  { %v1541_v25 = vsel %vm1537_vm15, %v1525_v4, %v1540_v40  ;;  %v1545_v22 = vsel %vm1537_vm15, %v1528_v52, %v1544_v38  ;;  %v1547_v15 = vsel %vm1535_vm0, %v1525_v4, %v1528_v52  ;;  %v1548_v51 = vsel %vm1538_vm3, %v1534_v33, 1326507024 }
 0x16f   :  { %vm1387_vm5 = vweird.f32 %v2151_v28  ;;  %vm1902_vm6 = vcmp.lt.s32.totalorder %v1901_v55, 0  ;;  %v1485_v37 = vsub.s32 4, %v3211_v46  ;;  %v1546_v50 = vsel %vm1536_vm2, %v1543_v24, %v1545_v22 }
 0x170   :  { %v1549_v49 = vsel %vm1537_vm15, %v1531_v47, %v1548_v51  ;;  %v1470_v13 = vsel %vm1902_vm6, 0, %v1901_v55  ;;  %v3253_v45 = vmul.u32.u64.low %v3224_v59, %v1546_v50  ;;  %v3254_v21 = vmul.u32.u64.high %v3224_v59, %v1546_v50, %v3253_v45 }
 0x171   :  { %v1550_v12 = vsel %vm1536_vm2, %v1547_v15, %v1549_v49  ;;  %v1471_v0 = vsub.s32 32, %v1470_v13  ;;  %v1472_v41 = vshll.u32 %v3220_v19, %v1470_v13  ;;  %v1475_v27 = vsub.s32 4294967266, %v1470_v13 }
 0x172   :  { %v1542_v14 = vsel %vm1536_vm2, %v1539_v60, %v1541_v25  ;;  %vm1391_vm4 = vcmp.eq.s32.totalorder %v3213_v48, 0  ;;  %v3261_v44 = vmul.u32.u64.low %v3224_v59, %v1550_v12  ;;  %v3262_v8 = vmul.u32.u64.high %v3224_v59, %v1550_v12, %v3261_v44 }
 0x173   :  { %v1617_v26 = vadd.s32 1, %v1907_v11  ;;  %vm1394_vm7 = vcmp.eq.s32.totalorder %v3213_v48, 2  ;;  %v1473_v6 = vshrl.u32 %v1455_v35, %v1471_v0  ;;  %v1476_v18 = vadd.s32 127, %v1475_v27 }
 0x174   :  { %v3267_v43 = vand.u32 8388607, %v1607_v23  ;;  %v1486_v54 = vsel %vm1401_vm1, %v1485_v37, %v3211_v46  ;;  %v1558_v19 = vmul.u32 %v3224_v59, %v1542_v14  ;;  %v1561_v20 = vadd.s32 1, %v3254_v21 }
 0x175   :  { %v2034_v63 = vpop.eup %2033  ;;  %vm1618_vm8 = vcmp.gt.s32.totalorder %v1617_v26, 0  ;;  %v1474_v58 = vor.u32 %v1473_v6, %v1472_v41  ;;  %v1477_v10 = vshll.u32 %v1476_v18, 23  ;;  %vm1390_vm9 = vcmp.lt.s32.totalorder %v3213_v48, 2 }
 0x176   :  { %v2036_v62 = vpop.eup %2035  ;;  %v1395_v16 = vxor.u32 2147483648, %v2034_v63  ;;  %v1619_v35 = vsel %vm1618_vm8, %v1617_v26, 0  ;;  %vm3277_vm11 = vcmp.le.f32.partialorder %v1399_v36, 0.7853982  ;;  %vm1560_vm10 = vc.u32 %v3262_v8, %v3253_v45 }
 0x177   :  { %v1392_v56 = vxor.u32 2147483648, %v2036_v62  ;;  %v1478_v59 = vor.u32 4788187, %v1477_v10  ;;  %v1481_v61 = vcvt.s32.f32 %v1474_v58  ;;  %v1562_v39 = vsel %vm1560_vm10, %v1561_v20, %v3254_v21 }
 0x178   :  { %v1396_v46 = vsel %vm1394_vm7, %v1395_v16, %v2036_v62  ;;  %v1488_v42 = vsel %vm3277_vm11, 0, %v1486_v54  ;;  %v1563_v36 = vadd.s32 %v1562_v39, %v1558_v19  ;;  %v1621_v52 = vand.u32 31, %v1619_v35 }
 0x179   :  { %v1393_v4 = vsel %vm1391_vm4, %v2034_v63, %v1392_v56  ;;  %v1479_v53 = vand.u32 2147483647, %v1478_v59  ;;  %v1615_v2 = vor.u32 8388608, %v3267_v43  ;;  %v1620_v11 = vshrl.u32 %v1619_v35, 5 }
 0x17a   :  { %v1397_v47 = vsel %vm1390_vm9, %v1393_v4, %v1396_v46  ;;  %v1564_v60 = vadd.s32 536870912, %v1563_v36  ;;  %v1622_v55 = vsub.s32 32, %v1621_v52  ;;  %v1624_v40 = vshll.u32 %v2102_v1, %v1621_v52 }
 0x17b   :  { %v1398_v33 = vsel %vm1387_vm5, nan, %v1397_v47  ;;  %v1482_v24 = vmul.f32 %v1481_v61, %v1479_v53  ;;  %v1492_v48 = vadd.s32 3, %v1488_v42  ;;  %v1627_v38 = vshll.u32 %v2103_v3, %v1621_v52 }
 0x17c   :  { %v1633_v25 = vshll.u32 %v2105_v7, %v1621_v52  ;;  %1826 = vst [vmem:[#allocation5 + $0x58] sm:$0xff] %v1398_v33  ;;  %v3296_v22 = vshrl.u32 %v1564_v60, 30  ;;  %v1625_v15 = vshrl.u32 %v2103_v3, %v1622_v55  ;;  %v1628_v51 = vshrl.u32 %v2104_v5, %v1622_v55 }
 0x17d   :  { %v1630_v28 = vshll.u32 %v2104_v5, %v1621_v52  ;;  %v1483_v37 = vxor.u32 2147483648, %v1482_v24  ;;  %v1631_v50 = vshrl.u32 %v2105_v7, %v1622_v55  ;;  %v1634_v49 = vshrl.u32 %v2106_v9, %v1622_v55 }
 0x17e   :  { %v1636_v13 = vshll.u32 %v2106_v9, %v1621_v52  ;;  %v1566_v12 = vshll.u32 %v3296_v22, 30  ;;  %v1623_v21 = vshrl.u32 %v2102_v1, %v1622_v55  ;;  %v1626_v0 = vor.u32 %v1625_v15, %v1624_v40 }
 0x17f   :  { %vm1639_vm12 = vcmp.lt.s32.totalorder %v1620_v11, 1  ;;  %v1484_v41 = vsel %vm1401_vm1, %v1483_v37, %v1482_v24  ;;  %v1629_v27 = vor.u32 %v1628_v51, %v1627_v38  ;;  %v1635_v14 = vor.u32 %v1634_v49, %v1633_v25 }
 0x180   :  { %v1637_v44 = vshrl.u32 %v2107_v17, %v1622_v55  ;;  %v1487_v26 = vsel %vm3277_vm11, %v2153_v29, %v1484_v41  ;;  %v3312_v6 = vsub.s32 %v1563_v36, %v1566_v12  ;;  %v1632_v18 = vor.u32 %v1631_v50, %v1630_v28 }
 0x181   :  { %vm1642_vm13 = vcmp.lt.s32.totalorder %v1620_v11, 4  ;;  %2037 = vcosq.f32 %v1487_v26  ;;  %vm1641_vm14 = vcmp.lt.s32.totalorder %v1620_v11, 3  ;;  %vm1640_vm0 = vcmp.lt.s32.totalorder %v1620_v11, 2 }
 0x182   :  { %v1638_v43 = vor.u32 %v1637_v44, %v1636_v13  ;;  %2039 = vsinq.f32 %v1487_v26  ;;  %v1569_v63 = vsub.s32 0, %v3312_v6  ;;  %v1644_v54 = vsel %vm1642_vm13, %v1632_v18, 2102212464 }
 0x183   :  { %v1647_v19 = vsel %vm1639_vm12, %v1626_v0, %v1629_v27  ;;  %v1648_v20 = vsel %vm1642_vm13, %v1635_v14, 920167782  ;;  %v1655_v62 = vshll.u32 %v1615_v2, 8  ;;  %v1714_v16 = vand.u32 2139095040, %v2159_v32 }
 0x184   :  { %v1493_v58 = vand.u32 3, %v1492_v48  ;;  %v1904_v10 = vmin.u32 %v1569_v63, %v3312_v6  ;;  %v1643_v35 = vsel %vm1639_vm12, %v1623_v21, %v1626_v0  ;;  %v1649_v56 = vsel %vm1641_vm14, %v1632_v18, %v1648_v20 }
 0x185   :  { %v1645_v34 = vsel %vm1641_vm14, %v1629_v27, %v1644_v54  ;;  %v1650_v46 = vsel %vm1640_vm0, %v1647_v19, %v1649_v56  ;;  %v1651_v59 = vsel %vm1639_vm12, %v1629_v27, %v1632_v18  ;;  %v1652_v61 = vsel %vm1642_vm13, %v1638_v43, 1326507024 }
 0x186   :  { %vm1491_vm1 = vweird.f32 %v2153_v29  ;;  %v1571_v39 = vclz %v1904_v10  ;;  %v1653_v4 = vsel %vm1641_vm14, %v1635_v14, %v1652_v61  ;;  %v1715_v52 = vshrl.u32 %v1714_v16, 23 }
 0x187   :  { %v3328_v42 = vmul.u32.u64.low %v1655_v62, %v1650_v46  ;;  %v3329_v36 = vmul.u32.u64.high %v1655_v62, %v1650_v46, %v3328_v42  ;;  %vm1494_vm15 = vcmp.lt.s32.totalorder %v1493_v58, 2  ;;  %v1646_v53 = vsel %vm1640_vm0, %v1643_v35, %v1645_v34 }
 0x188   :  { %v1905_v47 = vadd.s32 4294967294, %v1571_v39  ;;  %v1654_v2 = vsel %vm1640_vm0, %v1651_v59, %v1653_v4  ;;  %vm1495_vm2 = vcmp.eq.s32.totalorder %v1493_v58, 0  ;;  %v1911_v55 = vadd.s32 4294967169, %v1715_v52 }
 0x189   :  { %v3334_v33 = vmul.u32.u64.low %v1655_v62, %v1654_v2  ;;  %v3335_v60 = vmul.u32.u64.high %v1655_v62, %v1654_v2, %v3334_v33  ;;  %vm1498_vm3 = vcmp.eq.s32.totalorder %v1493_v58, 2  ;;  %v1559_v40 = vadd.s32 %v3253_v45, %v3262_v8 }
 0x18a   :  { %vm1906_vm5 = vcmp.lt.s32.totalorder %v1905_v47, 0  ;;  %v1711_v24 = vand.u32 2147483647, %v2159_v32  ;;  %v1662_v25 = vmul.u32 %v1655_v62, %v1646_v53  ;;  %v1665_v15 = vadd.s32 1, %v3329_v36 }
 0x18b   :  { %v2038_v48 = vpop.eup %2037  ;;  %v1574_v38 = vsel %vm1906_vm5, 0, %v1905_v47  ;;  %v1721_v51 = vadd.s32 1, %v1911_v55  ;;  %v1589_v12 = vsub.s32 4, %v3296_v22  ;;  %vm1664_vm6 = vc.u32 %v3335_v60, %v3328_v42 }
 0x18c   :  { %v2040_v11 = vpop.eup %2039  ;;  %v1499_v28 = vxor.u32 2147483648, %v2038_v48  ;;  %v1575_v37 = vsub.s32 32, %v1574_v38  ;;  %v1576_v50 = vshll.u32 %v3312_v6, %v1574_v38  ;;  %v1579_v49 = vsub.s32 4294967266, %v1574_v38 }
 0x18d   :  { %v1496_v13 = vxor.u32 2147483648, %v2040_v11  ;;  %vm1722_vm4 = vcmp.gt.s32.totalorder %v1721_v51, 0  ;;  %v1666_v0 = vsel %vm1664_vm6, %v1665_v15, %v3329_v36  ;;  %v1718_v14 = vand.u32 8388607, %v1711_v24 }
 0x18e   :  { %v1500_v45 = vsel %vm1498_vm3, %v1499_v28, %v2040_v11  ;;  %v1577_v8 = vshrl.u32 %v1559_v40, %v1575_v37  ;;  %v1580_v21 = vadd.s32 127, %v1579_v49  ;;  %v1667_v27 = vadd.s32 %v1666_v0, %v1662_v25 }
 0x18f   :  { %v1497_v41 = vsel %vm1495_vm2, %v2038_v48, %v1496_v13  ;;  %v1723_v44 = vsel %vm1722_vm4, %v1721_v51, 0  ;;  %vm1505_vm7 = vcmp.lt.s32.totalorder %v2155_v30, 0  ;;  %vm3356_vm8 = vcmp.le.f32.partialorder %v1503_v57, 0.7853982 }
 0x190   :  { %v1501_v26 = vsel %vm1494_vm15, %v1497_v41, %v1500_v45  ;;  %v1578_v6 = vor.u32 %v1577_v8, %v1576_v50  ;;  %v1581_v18 = vshll.u32 %v1580_v21, 23  ;;  %v1668_v63 = vadd.s32 536870912, %v1667_v27 }
 0x191   :  { %v1502_v43 = vsel %vm1491_vm1, nan, %v1501_v26  ;;  %v1725_v54 = vand.u32 31, %v1723_v44  ;;  %v1590_v16 = vsel %vm1505_vm7, %v1589_v12, %v3296_v22  ;;  %v1719_v29 = vor.u32 8388608, %v1718_v14 }
 0x192   :  { %v1582_v20 = vor.u32 4788187, %v1581_v18  ;;  %v1585_v62 = vcvt.s32.f32 %v1578_v6  ;;  %1827 = vst [vmem:[#allocation5 + $0x60] sm:$0xff] %v1502_v43  ;;  %v3363_v58 = vshrl.u32 %v1668_v63, 30  ;;  %v1724_v10 = vshrl.u32 %v1723_v44, 5 }
 0x193   :  { %v1726_v35 = vsub.s32 32, %v1725_v54  ;;  %v1728_v34 = vshll.u32 %v2102_v1, %v1725_v54  ;;  %v1731_v57 = vshll.u32 %v2103_v3, %v1725_v54  ;;  %v1734_v46 = vshll.u32 %v2104_v5, %v1725_v54 }
 0x194   :  { %v1583_v56 = vand.u32 2147483647, %v1582_v20  ;;  %v1670_v59 = vshll.u32 %v3363_v58, 30  ;;  %v1737_v39 = vshll.u32 %v2105_v7, %v1725_v54  ;;  %v1740_v22 = vshll.u32 %v2106_v9, %v1725_v54 }
 0x195   :  { %v1729_v61 = vshrl.u32 %v2103_v3, %v1726_v35  ;;  %v1732_v36 = vshrl.u32 %v2104_v5, %v1726_v35  ;;  %v1735_v52 = vshrl.u32 %v2105_v7, %v1726_v35  ;;  %v1738_v47 = vshrl.u32 %v2106_v9, %v1726_v35 }
 0x196   :  { %v1586_v4 = vmul.f32 %v1585_v62, %v1583_v56  ;;  %v1592_v53 = vsel %vm3356_vm8, 0, %v1590_v16  ;;  %v1671_v2 = vsub.s32 %v1667_v27, %v1670_v59  ;;  %v1741_v33 = vshrl.u32 %v2107_v17, %v1726_v35 }
 0x197   :  { %v1730_v40 = vor.u32 %v1729_v61, %v1728_v34  ;;  %v1733_v3 = vor.u32 %v1732_v36, %v1731_v57  ;;  %v1759_v48 = vshll.u32 %v1719_v29, 8  ;;  %v1736_v25 = vor.u32 %v1735_v52, %v1734_v46 }
 0x198   :  { %v1587_v55 = vxor.u32 2147483648, %v1586_v4  ;;  %v1673_v38 = vsub.s32 0, %v1671_v2  ;;  %v1739_v15 = vor.u32 %v1738_v47, %v1737_v39  ;;  %vm1743_vm9 = vcmp.lt.s32.totalorder %v1724_v10, 1 }
 0x199   :  { %v1727_v7 = vshrl.u32 %v2102_v1, %v1726_v35  ;;  %v1742_v9 = vor.u32 %v1741_v33, %v1740_v22  ;;  %vm1746_vm11 = vcmp.lt.s32.totalorder %v1724_v10, 4  ;;  %vm1745_vm10 = vcmp.lt.s32.totalorder %v1724_v10, 3 }
 0x19a   :  { %v1588_v5 = vsel %vm1505_vm7, %v1587_v55, %v1586_v4  ;;  %v1908_v17 = vmin.u32 %v1673_v38, %v1671_v2  ;;  %v1748_v11 = vsel %vm1746_vm11, %v1736_v25, 2102212464  ;;  %vm1744_vm12 = vcmp.lt.s32.totalorder %v1724_v10, 2 }
 0x19b   :  { %v1591_v51 = vsel %vm3356_vm8, %v2155_v30, %v1588_v5  ;;  %v1751_v28 = vsel %vm1743_vm9, %v1730_v40, %v1733_v3  ;;  %v1752_v37 = vsel %vm1746_vm11, %v1739_v15, 920167782  ;;  %v1596_v50 = vadd.s32 3, %v1592_v53 }
 0x19c   :  { %2041 = vcosq.f32 %v1591_v51  ;;  %v1675_v49 = vclz %v1908_v17  ;;  %v1747_v1 = vsel %vm1743_vm9, %v1727_v7, %v1730_v40  ;;  %v1749_v13 = vsel %vm1745_vm10, %v1733_v3, %v1748_v11 }
 0x19d   :  { %2043 = vsinq.f32 %v1591_v51  ;;  %v1753_v12 = vsel %vm1745_vm10, %v1736_v25, %v1752_v37  ;;  %v1755_v45 = vsel %vm1743_vm9, %v1733_v3, %v1736_v25  ;;  %v1756_v0 = vsel %vm1746_vm11, %v1742_v9, 1326507024 }
 0x19e   :  { %v1909_v8 = vadd.s32 4294967294, %v1675_v49  ;;  %v1754_v21 = vsel %vm1744_vm12, %v1751_v28, %v1753_v12  ;;  %v1757_v41 = vsel %vm1745_vm10, %v1739_v15, %v1756_v0  ;;  %v1663_v44 = vadd.s32 %v3328_v42, %v3335_v60 }
 0x19f   :  { %v3394_v27 = vmul.u32.u64.low %v1759_v48, %v1754_v21  ;;  %v3395_v14 = vmul.u32.u64.high %v1759_v48, %v1754_v21, %v3394_v27  ;;  %v1750_v26 = vsel %vm1744_vm12, %v1747_v1, %v1749_v13  ;;  %v1758_v6 = vsel %vm1744_vm12, %v1755_v45, %v1757_v41 }
 0x1a0   :  { %vm1910_vm13 = vcmp.lt.s32.totalorder %v1909_v8, 0  ;;  %v1597_v18 = vand.u32 3, %v1596_v50  ;;  %v3401_v63 = vmul.u32.u64.low %v1759_v48, %v1758_v6  ;;  %v3402_v54 = vmul.u32.u64.high %v1759_v48, %v1758_v6, %v3401_v63 }
 0x1a1   :  { %v1678_v43 = vsel %vm1910_vm13, 0, %v1909_v8  ;;  %v1766_v16 = vmul.u32 %v1759_v48, %v1750_v26  ;;  %v1769_v29 = vadd.s32 1, %v3395_v14  ;;  %vm1595_vm2 = vweird.f32 %v2155_v30 }
 0x1a2   :  { %v1679_v19 = vsub.s32 32, %v1678_v43  ;;  %v1680_v20 = vshll.u32 %v1671_v2, %v1678_v43  ;;  %v1683_v62 = vsub.s32 4294967266, %v1678_v43  ;;  %vm1599_vm14 = vcmp.eq.s32.totalorder %v1597_v18, 0 }
 0x1a3   :  { %vm1602_vm0 = vcmp.eq.s32.totalorder %v1597_v18, 2  ;;  %vm1768_vm1 = vc.u32 %v3402_v54, %v3394_v27  ;;  %vm1598_vm15 = vcmp.lt.s32.totalorder %v1597_v18, 2  ;;  %v1693_v2 = vsub.s32 4, %v3363_v58 }
 0x1a4   :  { %v1681_v35 = vshrl.u32 %v1663_v44, %v1679_v19  ;;  %v1684_v56 = vadd.s32 127, %v1683_v62  ;;  %v1770_v46 = vsel %vm1768_vm1, %v1769_v29, %v3395_v14  ;;  %vm1609_vm3 = vcmp.lt.s32.totalorder %v2157_v31, 0 }
 0x1a5   :  { %v1771_v61 = vadd.s32 %v1770_v46, %v1766_v16  ;;  %vm1608_vm5 = vcmp.le.f32.partialorder %v1607_v23, 0.7853982  ;;  %v1694_v48 = vsel %vm1609_vm3, %v1693_v2, %v3363_v58  ;;  %v1767_v37 = vadd.s32 %v3394_v27, %v3402_v54 }
 0x1a6   :  { %v2042_v34 = vpop.eup %2041  ;;  %v1682_v10 = vor.u32 %v1681_v35, %v1680_v20  ;;  %v1685_v57 = vshll.u32 %v1684_v56, 23  ;;  %v1696_v5 = vsel %vm1608_vm5, 0, %v1694_v48  ;;  %vm1699_vm9 = vweird.f32 %v2157_v31 }
 0x1a7   :  { %v2044_v42 = vpop.eup %2043  ;;  %v1603_v60 = vxor.u32 2147483648, %v2042_v34  ;;  %v1772_v52 = vadd.s32 536870912, %v1771_v61  ;;  %v1700_v51 = vadd.s32 3, %v1696_v5  ;;  %vm1713_vm11 = vcmp.lt.s32.totalorder %v2159_v32, 0 }
 0x1a8   :  { %v1600_v59 = vxor.u32 2147483648, %v2044_v42  ;;  %v1686_v22 = vor.u32 4788187, %v1685_v57  ;;  %v1689_v4 = vcvt.s32.f32 %v1682_v10  ;;  %vm1712_vm10 = vcmp.le.f32.partialorder %v1711_v24, 0.7853982 }
 0x1a9   :  { %v1604_v39 = vsel %vm1602_vm0, %v1603_v60, %v2044_v42  ;;  %v1773_v55 = vshrl.u32 %v1772_v52, 30  ;;  %v1701_v28 = vand.u32 3, %v1700_v51  ;;  %vm1803_vm0 = vweird.f32 %v2159_v32 }
 0x1aa   :  { %v1601_v36 = vsel %vm1599_vm14, %v2042_v34, %v1600_v59  ;;  %v1687_v53 = vand.u32 2147483647, %v1686_v22 }
 0x1ab   :  { %v1605_v47 = vsel %vm1598_vm15, %v1601_v36, %v1604_v39  ;;  %v1774_v3 = vshll.u32 %v1773_v55, 30  ;;  %vm1706_vm4 = vcmp.eq.s32.totalorder %v1701_v28, 2  ;;  %vm1703_vm7 = vcmp.eq.s32.totalorder %v1701_v28, 0 }
 0x1ac   :  { %v1606_v33 = vsel %vm1595_vm2, nan, %v1605_v47  ;;  %v1690_v40 = vmul.f32 %v1689_v4, %v1687_v53  ;;  %vm1702_vm8 = vcmp.lt.s32.totalorder %v1701_v28, 2  ;;  %v1797_v63 = vsub.s32 4, %v1773_v55 }
 0x1ad   :  { %1828 = vst [vmem:[#allocation5 + $0x68] sm:$0xff] %v1606_v33  ;;  %v1775_v38 = vsub.s32 %v1771_v61, %v1774_v3 }
 0x1ae   :  { %v1691_v30 = vxor.u32 2147483648, %v1690_v40  ;;  %v1798_v20 = vsel %vm1713_vm11, %v1797_v63, %v1773_v55 }
 0x1af   :  { %v1777_v7 = vsub.s32 0, %v1775_v38  ;;  %v1800_v16 = vsel %vm1712_vm10, 0, %v1798_v20 }
 0x1b0   :  { %v1692_v25 = vsel %vm1609_vm3, %v1691_v30, %v1690_v40  ;;  %v1804_v29 = vadd.s32 3, %v1800_v16 }
 0x1b1   :  { %v1695_v15 = vsel %vm1608_vm5, %v2157_v31, %v1692_v25  ;;  %v1912_v9 = vmin.u32 %v1777_v7, %v1775_v38 }
 0x1b2   :  { %2045 = vcosq.f32 %v1695_v15  ;;  %v1805_v35 = vand.u32 3, %v1804_v29 }
 0x1b3   :  { %2047 = vsinq.f32 %v1695_v15  ;;  %v1779_v17 = vclz %v1912_v9 }
 0x1b4   :  { %vm1810_vm12 = vcmp.eq.s32.totalorder %v1805_v35, 2  ;;  %vm1807_vm13 = vcmp.eq.s32.totalorder %v1805_v35, 0  ;;  %vm1806_vm14 = vcmp.lt.s32.totalorder %v1805_v35, 2 }
 0x1b5   :  { %v1913_v11 = vadd.s32 4294967294, %v1779_v17 }
 0x1b7   :  { %vm1914_vm6 = vcmp.lt.s32.totalorder %v1913_v11, 0 }
 0x1b8   :  { %v1782_v23 = vsel %vm1914_vm6, 0, %v1913_v11 }
 0x1b9   :  { %v1783_v50 = vsub.s32 32, %v1782_v23  ;;  %v1784_v49 = vshll.u32 %v1775_v38, %v1782_v23  ;;  %v1787_v58 = vsub.s32 4294967266, %v1782_v23 }
 0x1bb   :  { %v1785_v45 = vshrl.u32 %v1767_v37, %v1783_v50  ;;  %v1788_v8 = vadd.s32 127, %v1787_v58 }
 0x1bc   :  { %v2046_v1 = vpop.eup %2045 }
 0x1bd   :  { %v2048_v13 = vpop.eup %2047  ;;  %v1707_v12 = vxor.u32 2147483648, %v2046_v1  ;;  %v1786_v41 = vor.u32 %v1785_v45, %v1784_v49  ;;  %v1789_v14 = vshll.u32 %v1788_v8, 23 }
 0x1be   :  { %v1704_v21 = vxor.u32 2147483648, %v2048_v13 }
 0x1bf   :  { %v1708_v0 = vsel %vm1706_vm4, %v1707_v12, %v2048_v13  ;;  %v1790_v26 = vor.u32 4788187, %v1789_v14  ;;  %v1793_v6 = vcvt.s32.f32 %v1786_v41 }
 0x1c0   :  { %v1705_v27 = vsel %vm1703_vm7, %v2046_v1, %v1704_v21 }
 0x1c1   :  { %v1709_v44 = vsel %vm1702_vm8, %v1705_v27, %v1708_v0  ;;  %v1791_v43 = vand.u32 2147483647, %v1790_v26 }
 0x1c2   :  { %v1710_v18 = vsel %vm1699_vm9, nan, %v1709_v44 }
 0x1c3   :  { %1829 = vst [vmem:[#allocation5 + $0x70] sm:$0xff] %v1710_v18  ;;  %v1794_v54 = vmul.f32 %v1793_v6, %v1791_v43 }
 0x1c5   :  { %v1795_v19 = vxor.u32 2147483648, %v1794_v54 }
 0x1c7   :  { %v1796_v31 = vsel %vm1713_vm11, %v1795_v19, %v1794_v54 }
 0x1c8   :  { %v1799_v62 = vsel %vm1712_vm10, %v2159_v32, %v1796_v31 }
 0x1c9   :  { %2049 = vcosq.f32 %v1799_v62 }
 0x1ca   :  { %2051 = vsinq.f32 %v1799_v62 }
 0x1d3   :  { %v2050_v56 = vpop.eup %2049 }
 0x1d4   :  { %v2052_v34 = vpop.eup %2051  ;;  %v1811_v42 = vxor.u32 2147483648, %v2050_v56 }
 0x1d5   :  { %v1808_v60 = vxor.u32 2147483648, %v2052_v34 }
 0x1d6   :  { %v1812_v24 = vsel %vm1810_vm12, %v1811_v42, %v2052_v34 }
 0x1d7   :  { %v1809_v10 = vsel %vm1807_vm13, %v2050_v56, %v1808_v60 }
 0x1d8   :  { %v1813_v57 = vsel %vm1806_vm14, %v1809_v10, %v1812_v24 }
 0x1d9   :  { %v1814_v46 = vsel %vm1803_vm0, nan, %v1813_v57 }
 0x1da   :  { %1830 = vst [vmem:[#allocation5 + $0x78] sm:$0xff] %v1814_v46 }
 0x1db   :  { %2086 = shalt.err (!%p2083_p12)
}
 0x1dc   :  { %s2087_s22 = scalar_lea.hbm %s3434_s1, 2048 }
 0x1dd   :  { %p2088_p13 = scmp.ne.s32.totalorder %s3434_s1, %s2087_s22  ;;  %p2091_p0 = scmp.lt.u32.totalorder %s2087_s22, %s3434_s1 }
 0x1df   :  { %p2093_p1 = pnand %p2091_p0, %p2088_p13 }
 0x1e1   :  { %2096 = shalt.err (!%p2093_p1)
}
 0x1e2   :  { %s2109_s27 = smov 128   ;;  %s2110_s28 = smov 8  }
 0x1e3   :  { %1842 = dma.vmem_to_hbm [thread:$0]  %s1837_s18, 2048, %s3434_s1, [#allocation4], %s2109_s27, %s2109_s27, %s2110_s28  }
 0x1e4   :  { %2099 = dma.done.wait [#allocation4], 2048  }
 0x1e5   :  { %2100 = vsyncadd [#allocation4], 4294965248 }
 0x1e6   :  { %1846 = vsyncpa [#allocation3], 1 }
 0x1e7   :  { %1847 = vsyncpa [#allocation4], 1 }

</bundles_post_ra>
